<compile_context>
chip_gen: v7x
topology: tpu7x:2x2x1
jax: 0.10.0
libtpu: 0.0.40
codegen_flags: <defaults>
</compile_context>

<pallas_src>
import functools

import jax
import jax.numpy as jnp
from jax.experimental import pallas as pl
from jax.experimental.pallas import tpu as pltpu

_LAB_THRESH = 0.008856  # CIE threshold used by OpenCV


def _rgb_to_lab8(rgb_nchw):
    """OpenCV-style RGB->LAB for 8-bit images (float-math path).

    Input:  float array (..., 3, H, W), RGB in [0, 1] (channel 0 = R).
    Output: (L8, a8, b8) float arrays (..., H, W); integer-valued in [0, 255]
            (the uint8 LAB values the torch module gets from cv2, before its /255).
    Pure jnp -> usable both inside the Pallas kernel and in the plain-JAX reference.
    """
    x = rgb_nchw.astype(jnp.float32)
    # torch module: (rgb * 255).astype(np.uint8) -> truncation, then cv2 scales /255.
    q = jnp.clip(jnp.floor(x * 255.0), 0.0, 255.0) * (1.0 / 255.0)
    r = q[..., 0, :, :]
    g = q[..., 1, :, :]
    b = q[..., 2, :, :]

    X = 0.412453 * r + 0.357580 * g + 0.180423 * b
    Y = 0.212671 * r + 0.715160 * g + 0.072169 * b
    Z = 0.019334 * r + 0.119193 * g + 0.950227 * b
    X = X * (1.0 / 0.950456)
    Z = Z * (1.0 / 1.088754)

    def _f(t):
        # Cube root via exp/log: 2 EUP ops that overlap the VPU-bound filter for free.
        cbrt = jnp.exp(jnp.log(jnp.maximum(t, 1e-30)) * (1.0 / 3.0))
        return jnp.where(t > _LAB_THRESH, cbrt, 7.787 * t + 16.0 / 116.0)

    fx, fy, fz = _f(X), _f(Y), _f(Z)
    L = jnp.where(Y > _LAB_THRESH, 116.0 * fy - 16.0, 903.3 * Y)
    A = 500.0 * (fx - fy) + 128.0
    B = 200.0 * (fy - fz) + 128.0
    L8 = L * (255.0 / 100.0)

    def _to_u8(v):  # saturate_cast<uchar>: round + clamp
        return jnp.clip(jnp.floor(v + 0.5), 0.0, 255.0)

    return _to_u8(L8), _to_u8(A), _to_u8(B)


def _lab_channel_loss_kernel(inp_ref, tgt_ref, out_ref, padh_ref, padw_ref, *,
                             patch_size):
    """One grid step: `nb` full images; writes one partial sum-of-squares block."""
    pad = patch_size // 2
    nb, _, H, W = inp_ref.shape

    x = inp_ref[...].astype(jnp.float32)      # (nb, 3, H, W)
    y = tgt_ref[...].astype(jnp.float32)

    # LAB (exact integers 0..255) and immediate channel differences; the XYZ / fx/fy/fz
    # temporaries die here, only three (nb, H, W) diff planes stay live for the filter.
    lab_x = _rgb_to_lab8(x)
    lab_y = _rgb_to_lab8(y)
    diffs = [lab_x[c] - lab_y[c] for c in range(3)]   # exact ints in [-255, 255]

    # Zero the padded scratch (the pad strips must read back as zeros; the interiors
    # are always overwritten before being read, every channel).
    padh_ref[...] = jnp.zeros_like(padh_ref)
    padw_ref[...] = jnp.zeros_like(padw_ref)

    sq = jnp.zeros((nb, H, W), jnp.float32)
    for c in range(3):
        # Box filter is linear: filter(lab_x) - filter(lab_y) == filter(lab_x - lab_y).
        # Separable shift-add box SUM, zero padded: patch_size taps per axis.
        padh_ref[:, pad:pad + H, :] = diffs[c]
        vsum = padh_ref[:, 0:H, :]
        for k in range(1, patch_size):
            vsum = vsum + padh_ref[:, k:k + H, :]      # vertical (sublane) taps

        padw_ref[:, :, pad:pad + W] = vsum
        box = padw_ref[:, :, 0:W]
        for k in range(1, patch_size):
            box = box + padw_ref[:, :, k:k + W]        # horizontal (lane) taps

        sq = sq + box * box

    # Single cross-lane reduce per program; dense (unmasked) writeback of the scalar
    # partial.  Each program owns its own output block, so the batch grid axis can be
    # "parallel" (dual-TC on v7x) with no races; host sums partials[:, 0, 0].
    out_ref[...] = jnp.full(out_ref.shape, jnp.sum(sq), dtype=jnp.float32)


def lab_channel_loss(inp, tgt, *, patch_size=15, batch_block=None):
    """inp, tgt: (N, 3, H, W) RGB in [0, 1] (f32 or bf16). Returns scalar f32 loss."""
    N, C, H, W = inp.shape
    assert tgt.shape == inp.shape
    assert C == 3, "LabChannelLoss expects RGB inputs (C=3)"
    assert patch_size % 2 == 1, "odd patch_size required for same-size conv output"
    pad = patch_size // 2
    itemsize = jnp.dtype(inp.dtype).itemsize

    # VMEM budget: 75% of the chip's capacity (64 MiB fallback ~= v7x per-TC VMEM).
    try:
        vmem_cap = int(pltpu.get_tpu_info().vmem_capacity_bytes)
    except Exception:
        vmem_cap = 64 * 1024 * 1024
    vmem_budget = int(vmem_cap * 0.75)

    # Per-image-per-step footprint: 2 inputs x 2 pipeline buffers of the (3,H,W) block,
    # ~8 live f32 planes during conversion/filtering, plus the two padded scratches.
    per_img = (2 * 2 * 3 * H * W * itemsize
               + 8 * H * W * 4
               + ((H + 2 * pad) * W + H * (W + 2 * pad)) * 4)

    if batch_block is None:
        cap = max(1, N // 2)   # >= 2 grid steps so both v7x TensorCores get work
        cands = [d for d in range(1, N + 1)
                 if N % d == 0 and d <= cap and d * per_img <= vmem_budget]
        if not cands:
            cands = [1]
        even = [d for d in cands if (N // d) % 2 == 0]   # prefer even step counts
        batch_block = max(even) if even else max(cands)
    assert N % batch_block == 0, "batch_block must divide N"
    nb = batch_block
    g = N // nb

    kernel = functools.partial(_lab_channel_loss_kernel, patch_size=patch_size)

    cost = pl.CostEstimate(
        flops=int(N * H * W * (110 + 6 * patch_size)),
        transcendentals=int(N * H * W * 12),
        bytes_accessed=int(2 * N * 3 * H * W * itemsize + g * 8 * 128 * 4),
    )

    partials = pl.pallas_call(
        kernel,
        out_shape=jax.ShapeDtypeStruct((g, 8, 128), jnp.float32),
        grid_spec=pltpu.PrefetchScalarGridSpec(
            num_scalar_prefetch=0,
            grid=(g,),
            in_specs=[
                pl.BlockSpec((nb, 3, H, W), lambda i: (i, 0, 0, 0)),
                pl.BlockSpec((nb, 3, H, W), lambda i: (i, 0, 0, 0)),
            ],
            out_specs=pl.BlockSpec((1, 8, 128), lambda i: (i, 0, 0)),
            scratch_shapes=[
                pltpu.VMEM((nb, H + 2 * pad, W), jnp.float32),   # vertical-pass pad
                pltpu.VMEM((nb, H, W + 2 * pad), jnp.float32),   # horizontal-pass pad
            ],
        ),
        compiler_params=pltpu.CompilerParams(
            dimension_semantics=("parallel",),
            vmem_limit_bytes=int(vmem_budget),
        ),
        cost_estimate=cost,
    )(inp, tgt)

    total = jnp.sum(partials[:, 0, 0])
    # Kernel works on integer-valued LAB (0..255); the module divides LAB by 255 before
    # the (linear) conv and the (quadratic) MSE, so fold 1/255^2 in here.
    return total / (jnp.float32(N * H * W) * jnp.float32(255.0 * 255.0))


# ----------------------------- plain-JAX reference -----------------------------


def _box_sum_ref(x, patch_size):
    """Zero-padded patch_size x patch_size box SUM filter on (N, H, W)."""
    p = patch_size // 2
    _, H, W = x.shape
    xp = jnp.pad(x, ((0, 0), (p, p), (0, 0)))
    rs = xp[:, 0:H, :]
    for a in range(1, patch_size):
        rs = rs + xp[:, a:a + H, :]
    rp = jnp.pad(rs, ((0, 0), (0, 0), (p, p)))
    out = rp[:, :, 0:W]
    for b in range(1, patch_size):
        out = out + rp[:, :, b:b + W]
    return out


def _reference(inp, tgt, patch_size):
    """Faithful re-statement of the PyTorch forward (shared LAB helper, explicit conv)."""
    lab_in = [c / 255.0 for c in _rgb_to_lab8(inp)]
    lab_tg = [c / 255.0 for c in _rgb_to_lab8(tgt)]
    loss = jnp.float32(0.0)
    for c in range(3):
        fi = _box_sum_ref(lab_in[c], patch_size)
        ft = _box_sum_ref(lab_tg[c], patch_size)
        loss = loss + jnp.mean((fi - ft) ** 2)
    return loss


if __name__ == "__main__":
    key = jax.random.PRNGKey(0)
    k1, k2 = jax.random.split(key)
    N, C, H, W = 2, 3, 16, 16
    patch_size = 15  # module default (odd)

    inp = jax.random.uniform(k1, (N, C, H, W), dtype=jnp.float32)
    tgt = jax.random.uniform(k2, (N, C, H, W), dtype=jnp.float32)

    loss = lab_channel_loss(inp, tgt, patch_size=patch_size)
    loss = jax.block_until_ready(loss)

    ref = jax.block_until_ready(_reference(inp, tgt, patch_size))
    # Loose-ish rtol: kernel filters exact integer LAB then folds 1/255^2; reference
    # divides by 255 first, and a borderline uint8 rounding flip (Mosaic vs XLA exp/log)
    # shifts the loss ~1e-3 rel.
    assert jnp.allclose(loss, ref, atol=1e-5, rtol=5e-3), (loss, ref)

    print("KERNEL_OK")
</pallas_src>

<mosaic_0001>
module attributes {stable_mosaic.version = 11 : i64} {
  func.func @_lab_channel_loss_kernel(%arg0: i32, %arg1: memref<1x3x16x16xf32, #tpu.memory_space<vmem>>, %arg2: memref<1x3x16x16xf32, #tpu.memory_space<vmem>>, %arg3: memref<1x8x128xf32, #tpu.memory_space<vmem>>, %arg4: memref<1x30x16xf32, #tpu.memory_space<vmem>>, %arg5: memref<1x16x30xf32, #tpu.memory_space<vmem>>) attributes {dimension_semantics = [#tpu.dimension_semantics<parallel>], iteration_bounds = array<i64: 2>, scalar_prefetch = 0 : i64, scratch_operands = 2 : i64, tpu.core_type = #tpu.core_type<tc>, window_params = [{transform_indices = @transform_0, window_bounds = array<i64: 1, 3, 16, 16>}, {transform_indices = @transform_1, window_bounds = array<i64: 1, 3, 16, 16>}, {transform_indices = @transform_2, window_bounds = array<i64: 1, 8, 128>}]} {
    %c0 = arith.constant 0 : index
    %c0_0 = arith.constant 0 : index
    %c0_1 = arith.constant 0 : index
    %c0_2 = arith.constant 0 : index
    %0 = vector.load %arg1[%c0, %c0_0, %c0_1, %c0_2] : memref<1x3x16x16xf32, #tpu.memory_space<vmem>>, vector<1x3x16x16xf32>
    %c0_3 = arith.constant 0 : index
    %c0_4 = arith.constant 0 : index
    %c0_5 = arith.constant 0 : index
    %c0_6 = arith.constant 0 : index
    %1 = vector.load %arg2[%c0_3, %c0_4, %c0_5, %c0_6] : memref<1x3x16x16xf32, #tpu.memory_space<vmem>>, vector<1x3x16x16xf32>
    %cst = arith.constant 2.550000e+02 : f32
    %2 = vector.broadcast %cst : f32 to vector<1x3x16x16xf32>
    %3 = arith.mulf %0, %2 : vector<1x3x16x16xf32>
    %4 = math.floor %3 : vector<1x3x16x16xf32>
    %cst_7 = arith.constant 0.000000e+00 : f32
    %cst_8 = arith.constant 2.550000e+02 : f32
    %5 = vector.broadcast %cst_7 : f32 to vector<1x3x16x16xf32>
    %6 = arith.maximumf %5, %4 : vector<1x3x16x16xf32>
    %7 = vector.broadcast %cst_8 : f32 to vector<1x3x16x16xf32>
    %8 = arith.minimumf %7, %6 : vector<1x3x16x16xf32>
    %cst_9 = arith.constant 0.00392156886 : f32
    %9 = vector.broadcast %cst_9 : f32 to vector<1x3x16x16xf32>
    %10 = arith.mulf %8, %9 : vector<1x3x16x16xf32>
    %11 = vector.extract_strided_slice %10 {offsets = [0, 0, 0, 0], sizes = [1, 1, 16, 16], strides = [1, 1, 1, 1]} : vector<1x3x16x16xf32> to vector<1x1x16x16xf32>
    %12 = vector.shape_cast %11 : vector<1x1x16x16xf32> to vector<1x16x16xf32>
    %13 = vector.extract_strided_slice %10 {offsets = [0, 1, 0, 0], sizes = [1, 1, 16, 16], strides = [1, 1, 1, 1]} : vector<1x3x16x16xf32> to vector<1x1x16x16xf32>
    %14 = vector.shape_cast %13 : vector<1x1x16x16xf32> to vector<1x16x16xf32>
    %15 = vector.extract_strided_slice %10 {offsets = [0, 2, 0, 0], sizes = [1, 1, 16, 16], strides = [1, 1, 1, 1]} : vector<1x3x16x16xf32> to vector<1x1x16x16xf32>
    %16 = vector.shape_cast %15 : vector<1x1x16x16xf32> to vector<1x16x16xf32>
    %cst_10 = arith.constant 4.124530e-01 : f32
    %17 = vector.broadcast %cst_10 : f32 to vector<1x16x16xf32>
    %18 = arith.mulf %17, %12 : vector<1x16x16xf32>
    %cst_11 = arith.constant 3.575800e-01 : f32
    %19 = vector.broadcast %cst_11 : f32 to vector<1x16x16xf32>
    %20 = arith.mulf %19, %14 : vector<1x16x16xf32>
    %21 = arith.addf %18, %20 : vector<1x16x16xf32>
    %cst_12 = arith.constant 1.804230e-01 : f32
    %22 = vector.broadcast %cst_12 : f32 to vector<1x16x16xf32>
    %23 = arith.mulf %22, %16 : vector<1x16x16xf32>
    %24 = arith.addf %21, %23 : vector<1x16x16xf32>
    %cst_13 = arith.constant 2.126710e-01 : f32
    %25 = vector.broadcast %cst_13 : f32 to vector<1x16x16xf32>
    %26 = arith.mulf %25, %12 : vector<1x16x16xf32>
    %cst_14 = arith.constant 7.151600e-01 : f32
    %27 = vector.broadcast %cst_14 : f32 to vector<1x16x16xf32>
    %28 = arith.mulf %27, %14 : vector<1x16x16xf32>
    %29 = arith.addf %26, %28 : vector<1x16x16xf32>
    %cst_15 = arith.constant 7.216900e-02 : f32
    %30 = vector.broadcast %cst_15 : f32 to vector<1x16x16xf32>
    %31 = arith.mulf %30, %16 : vector<1x16x16xf32>
    %32 = arith.addf %29, %31 : vector<1x16x16xf32>
    %cst_16 = arith.constant 1.933400e-02 : f32
    %33 = vector.broadcast %cst_16 : f32 to vector<1x16x16xf32>
    %34 = arith.mulf %33, %12 : vector<1x16x16xf32>
    %cst_17 = arith.constant 1.191930e-01 : f32
    %35 = vector.broadcast %cst_17 : f32 to vector<1x16x16xf32>
    %36 = arith.mulf %35, %14 : vector<1x16x16xf32>
    %37 = arith.addf %34, %36 : vector<1x16x16xf32>
    %cst_18 = arith.constant 9.502270e-01 : f32
    %38 = vector.broadcast %cst_18 : f32 to vector<1x16x16xf32>
    %39 = arith.mulf %38, %16 : vector<1x16x16xf32>
    %40 = arith.addf %37, %39 : vector<1x16x16xf32>
    %cst_19 = arith.constant 1.05212653 : f32
    %41 = vector.broadcast %cst_19 : f32 to vector<1x16x16xf32>
    %42 = arith.mulf %24, %41 : vector<1x16x16xf32>
    %cst_20 = arith.constant 0.918481112 : f32
    %43 = vector.broadcast %cst_20 : f32 to vector<1x16x16xf32>
    %44 = arith.mulf %40, %43 : vector<1x16x16xf32>
    %cst_21 = arith.constant 1.000000e-30 : f32
    %45 = vector.broadcast %cst_21 : f32 to vector<1x16x16xf32>
    %46 = arith.maximumf %42, %45 : vector<1x16x16xf32>
    %47 = math.log %46 : vector<1x16x16xf32>
    %cst_22 = arith.constant 0.333333343 : f32
    %48 = vector.broadcast %cst_22 : f32 to vector<1x16x16xf32>
    %49 = arith.mulf %47, %48 : vector<1x16x16xf32>
    %50 = math.exp %49 : vector<1x16x16xf32>
    %cst_23 = arith.constant 8.856000e-03 : f32
    %51 = vector.broadcast %cst_23 : f32 to vector<1x16x16xf32>
    %52 = arith.cmpf ogt, %42, %51 : vector<1x16x16xf32>
    %cst_24 = arith.constant 7.787000e+00 : f32
    %53 = vector.broadcast %cst_24 : f32 to vector<1x16x16xf32>
    %54 = arith.mulf %53, %42 : vector<1x16x16xf32>
    %cst_25 = arith.constant 0.137931034 : f32
    %55 = vector.broadcast %cst_25 : f32 to vector<1x16x16xf32>
    %56 = arith.addf %54, %55 : vector<1x16x16xf32>
    %57 = arith.select %52, %50, %56 : vector<1x16x16xi1>, vector<1x16x16xf32>
    %cst_26 = arith.constant 1.000000e-30 : f32
    %58 = vector.broadcast %cst_26 : f32 to vector<1x16x16xf32>
    %59 = arith.maximumf %32, %58 : vector<1x16x16xf32>
    %60 = math.log %59 : vector<1x16x16xf32>
    %cst_27 = arith.constant 0.333333343 : f32
    %61 = vector.broadcast %cst_27 : f32 to vector<1x16x16xf32>
    %62 = arith.mulf %60, %61 : vector<1x16x16xf32>
    %63 = math.exp %62 : vector<1x16x16xf32>
    %cst_28 = arith.constant 8.856000e-03 : f32
    %64 = vector.broadcast %cst_28 : f32 to vector<1x16x16xf32>
    %65 = arith.cmpf ogt, %32, %64 : vector<1x16x16xf32>
    %cst_29 = arith.constant 7.787000e+00 : f32
    %66 = vector.broadcast %cst_29 : f32 to vector<1x16x16xf32>
    %67 = arith.mulf %66, %32 : vector<1x16x16xf32>
    %cst_30 = arith.constant 0.137931034 : f32
    %68 = vector.broadcast %cst_30 : f32 to vector<1x16x16xf32>
    %69 = arith.addf %67, %68 : vector<1x16x16xf32>
    %70 = arith.select %65, %63, %69 : vector<1x16x16xi1>, vector<1x16x16xf32>
    %cst_31 = arith.constant 1.000000e-30 : f32
    %71 = vector.broadcast %cst_31 : f32 to vector<1x16x16xf32>
    %72 = arith.maximumf %44, %71 : vector<1x16x16xf32>
    %73 = math.log %72 : vector<1x16x16xf32>
    %cst_32 = arith.constant 0.333333343 : f32
    %74 = vector.broadcast %cst_32 : f32 to vector<1x16x16xf32>
    %75 = arith.mulf %73, %74 : vector<1x16x16xf32>
    %76 = math.exp %75 : vector<1x16x16xf32>
    %cst_33 = arith.constant 8.856000e-03 : f32
    %77 = vector.broadcast %cst_33 : f32 to vector<1x16x16xf32>
    %78 = arith.cmpf ogt, %44, %77 : vector<1x16x16xf32>
    %cst_34 = arith.constant 7.787000e+00 : f32
    %79 = vector.broadcast %cst_34 : f32 to vector<1x16x16xf32>
    %80 = arith.mulf %79, %44 : vector<1x16x16xf32>
    %cst_35 = arith.constant 0.137931034 : f32
    %81 = vector.broadcast %cst_35 : f32 to vector<1x16x16xf32>
    %82 = arith.addf %80, %81 : vector<1x16x16xf32>
    %83 = arith.select %78, %76, %82 : vector<1x16x16xi1>, vector<1x16x16xf32>
    %cst_36 = arith.constant 8.856000e-03 : f32
    %84 = vector.broadcast %cst_36 : f32 to vector<1x16x16xf32>
    %85 = arith.cmpf ogt, %32, %84 : vector<1x16x16xf32>
    %cst_37 = arith.constant 1.160000e+02 : f32
    %86 = vector.broadcast %cst_37 : f32 to vector<1x16x16xf32>
    %87 = arith.mulf %86, %70 : vector<1x16x16xf32>
    %cst_38 = arith.constant 1.600000e+01 : f32
    %88 = vector.broadcast %cst_38 : f32 to vector<1x16x16xf32>
    %89 = arith.subf %87, %88 : vector<1x16x16xf32>
    %cst_39 = arith.constant 903.299987 : f32
    %90 = vector.broadcast %cst_39 : f32 to vector<1x16x16xf32>
    %91 = arith.mulf %90, %32 : vector<1x16x16xf32>
    %92 = arith.select %85, %89, %91 : vector<1x16x16xi1>, vector<1x16x16xf32>
    %93 = arith.subf %57, %70 : vector<1x16x16xf32>
    %cst_40 = arith.constant 5.000000e+02 : f32
    %94 = vector.broadcast %cst_40 : f32 to vector<1x16x16xf32>
    %95 = arith.mulf %94, %93 : vector<1x16x16xf32>
    %cst_41 = arith.constant 1.280000e+02 : f32
    %96 = vector.broadcast %cst_41 : f32 to vector<1x16x16xf32>
    %97 = arith.addf %95, %96 : vector<1x16x16xf32>
    %98 = arith.subf %70, %83 : vector<1x16x16xf32>
    %cst_42 = arith.constant 2.000000e+02 : f32
    %99 = vector.broadcast %cst_42 : f32 to vector<1x16x16xf32>
    %100 = arith.mulf %99, %98 : vector<1x16x16xf32>
    %cst_43 = arith.constant 1.280000e+02 : f32
    %101 = vector.broadcast %cst_43 : f32 to vector<1x16x16xf32>
    %102 = arith.addf %100, %101 : vector<1x16x16xf32>
    %cst_44 = arith.constant 2.550000e+00 : f32
    %103 = vector.broadcast %cst_44 : f32 to vector<1x16x16xf32>
    %104 = arith.mulf %92, %103 : vector<1x16x16xf32>
    %cst_45 = arith.constant 5.000000e-01 : f32
    %105 = vector.broadcast %cst_45 : f32 to vector<1x16x16xf32>
    %106 = arith.addf %104, %105 : vector<1x16x16xf32>
    %107 = math.floor %106 : vector<1x16x16xf32>
    %cst_46 = arith.constant 0.000000e+00 : f32
    %cst_47 = arith.constant 2.550000e+02 : f32
    %108 = vector.broadcast %cst_46 : f32 to vector<1x16x16xf32>
    %109 = arith.maximumf %108, %107 : vector<1x16x16xf32>
    %110 = vector.broadcast %cst_47 : f32 to vector<1x16x16xf32>
    %111 = arith.minimumf %110, %109 : vector<1x16x16xf32>
    %cst_48 = arith.constant 5.000000e-01 : f32
    %112 = vector.broadcast %cst_48 : f32 to vector<1x16x16xf32>
    %113 = arith.addf %97, %112 : vector<1x16x16xf32>
    %114 = math.floor %113 : vector<1x16x16xf32>
    %cst_49 = arith.constant 0.000000e+00 : f32
    %cst_50 = arith.constant 2.550000e+02 : f32
    %115 = vector.broadcast %cst_49 : f32 to vector<1x16x16xf32>
    %116 = arith.maximumf %115, %114 : vector<1x16x16xf32>
    %117 = vector.broadcast %cst_50 : f32 to vector<1x16x16xf32>
    %118 = arith.minimumf %117, %116 : vector<1x16x16xf32>
    %cst_51 = arith.constant 5.000000e-01 : f32
    %119 = vector.broadcast %cst_51 : f32 to vector<1x16x16xf32>
    %120 = arith.addf %102, %119 : vector<1x16x16xf32>
    %121 = math.floor %120 : vector<1x16x16xf32>
    %cst_52 = arith.constant 0.000000e+00 : f32
    %cst_53 = arith.constant 2.550000e+02 : f32
    %122 = vector.broadcast %cst_52 : f32 to vector<1x16x16xf32>
    %123 = arith.maximumf %122, %121 : vector<1x16x16xf32>
    %124 = vector.broadcast %cst_53 : f32 to vector<1x16x16xf32>
    %125 = arith.minimumf %124, %123 : vector<1x16x16xf32>
    %cst_54 = arith.constant 2.550000e+02 : f32
    %126 = vector.broadcast %cst_54 : f32 to vector<1x3x16x16xf32>
    %127 = arith.mulf %1, %126 : vector<1x3x16x16xf32>
    %128 = math.floor %127 : vector<1x3x16x16xf32>
    %cst_55 = arith.constant 0.000000e+00 : f32
    %cst_56 = arith.constant 2.550000e+02 : f32
    %129 = vector.broadcast %cst_55 : f32 to vector<1x3x16x16xf32>
    %130 = arith.maximumf %129, %128 : vector<1x3x16x16xf32>
    %131 = vector.broadcast %cst_56 : f32 to vector<1x3x16x16xf32>
    %132 = arith.minimumf %131, %130 : vector<1x3x16x16xf32>
    %cst_57 = arith.constant 0.00392156886 : f32
    %133 = vector.broadcast %cst_57 : f32 to vector<1x3x16x16xf32>
    %134 = arith.mulf %132, %133 : vector<1x3x16x16xf32>
    %135 = vector.extract_strided_slice %134 {offsets = [0, 0, 0, 0], sizes = [1, 1, 16, 16], strides = [1, 1, 1, 1]} : vector<1x3x16x16xf32> to vector<1x1x16x16xf32>
    %136 = vector.shape_cast %135 : vector<1x1x16x16xf32> to vector<1x16x16xf32>
    %137 = vector.extract_strided_slice %134 {offsets = [0, 1, 0, 0], sizes = [1, 1, 16, 16], strides = [1, 1, 1, 1]} : vector<1x3x16x16xf32> to vector<1x1x16x16xf32>
    %138 = vector.shape_cast %137 : vector<1x1x16x16xf32> to vector<1x16x16xf32>
    %139 = vector.extract_strided_slice %134 {offsets = [0, 2, 0, 0], sizes = [1, 1, 16, 16], strides = [1, 1, 1, 1]} : vector<1x3x16x16xf32> to vector<1x1x16x16xf32>
    %140 = vector.shape_cast %139 : vector<1x1x16x16xf32> to vector<1x16x16xf32>
    %cst_58 = arith.constant 4.124530e-01 : f32
    %141 = vector.broadcast %cst_58 : f32 to vector<1x16x16xf32>
    %142 = arith.mulf %141, %136 : vector<1x16x16xf32>
    %cst_59 = arith.constant 3.575800e-01 : f32
    %143 = vector.broadcast %cst_59 : f32 to vector<1x16x16xf32>
    %144 = arith.mulf %143, %138 : vector<1x16x16xf32>
    %145 = arith.addf %142, %144 : vector<1x16x16xf32>
    %cst_60 = arith.constant 1.804230e-01 : f32
    %146 = vector.broadcast %cst_60 : f32 to vector<1x16x16xf32>
    %147 = arith.mulf %146, %140 : vector<1x16x16xf32>
    %148 = arith.addf %145, %147 : vector<1x16x16xf32>
    %cst_61 = arith.constant 2.126710e-01 : f32
    %149 = vector.broadcast %cst_61 : f32 to vector<1x16x16xf32>
    %150 = arith.mulf %149, %136 : vector<1x16x16xf32>
    %cst_62 = arith.constant 7.151600e-01 : f32
    %151 = vector.broadcast %cst_62 : f32 to vector<1x16x16xf32>
    %152 = arith.mulf %151, %138 : vector<1x16x16xf32>
    %153 = arith.addf %150, %152 : vector<1x16x16xf32>
    %cst_63 = arith.constant 7.216900e-02 : f32
    %154 = vector.broadcast %cst_63 : f32 to vector<1x16x16xf32>
    %155 = arith.mulf %154, %140 : vector<1x16x16xf32>
    %156 = arith.addf %153, %155 : vector<1x16x16xf32>
    %cst_64 = arith.constant 1.933400e-02 : f32
    %157 = vector.broadcast %cst_64 : f32 to vector<1x16x16xf32>
    %158 = arith.mulf %157, %136 : vector<1x16x16xf32>
    %cst_65 = arith.constant 1.191930e-01 : f32
    %159 = vector.broadcast %cst_65 : f32 to vector<1x16x16xf32>
    %160 = arith.mulf %159, %138 : vector<1x16x16xf32>
    %161 = arith.addf %158, %160 : vector<1x16x16xf32>
    %cst_66 = arith.constant 9.502270e-01 : f32
    %162 = vector.broadcast %cst_66 : f32 to vector<1x16x16xf32>
    %163 = arith.mulf %162, %140 : vector<1x16x16xf32>
    %164 = arith.addf %161, %163 : vector<1x16x16xf32>
    %cst_67 = arith.constant 1.05212653 : f32
    %165 = vector.broadcast %cst_67 : f32 to vector<1x16x16xf32>
    %166 = arith.mulf %148, %165 : vector<1x16x16xf32>
    %cst_68 = arith.constant 0.918481112 : f32
    %167 = vector.broadcast %cst_68 : f32 to vector<1x16x16xf32>
    %168 = arith.mulf %164, %167 : vector<1x16x16xf32>
    %cst_69 = arith.constant 1.000000e-30 : f32
    %169 = vector.broadcast %cst_69 : f32 to vector<1x16x16xf32>
    %170 = arith.maximumf %166, %169 : vector<1x16x16xf32>
    %171 = math.log %170 : vector<1x16x16xf32>
    %cst_70 = arith.constant 0.333333343 : f32
    %172 = vector.broadcast %cst_70 : f32 to vector<1x16x16xf32>
    %173 = arith.mulf %171, %172 : vector<1x16x16xf32>
    %174 = math.exp %173 : vector<1x16x16xf32>
    %cst_71 = arith.constant 8.856000e-03 : f32
    %175 = vector.broadcast %cst_71 : f32 to vector<1x16x16xf32>
    %176 = arith.cmpf ogt, %166, %175 : vector<1x16x16xf32>
    %cst_72 = arith.constant 7.787000e+00 : f32
    %177 = vector.broadcast %cst_72 : f32 to vector<1x16x16xf32>
    %178 = arith.mulf %177, %166 : vector<1x16x16xf32>
    %cst_73 = arith.constant 0.137931034 : f32
    %179 = vector.broadcast %cst_73 : f32 to vector<1x16x16xf32>
    %180 = arith.addf %178, %179 : vector<1x16x16xf32>
    %181 = arith.select %176, %174, %180 : vector<1x16x16xi1>, vector<1x16x16xf32>
    %cst_74 = arith.constant 1.000000e-30 : f32
    %182 = vector.broadcast %cst_74 : f32 to vector<1x16x16xf32>
    %183 = arith.maximumf %156, %182 : vector<1x16x16xf32>
    %184 = math.log %183 : vector<1x16x16xf32>
    %cst_75 = arith.constant 0.333333343 : f32
    %185 = vector.broadcast %cst_75 : f32 to vector<1x16x16xf32>
    %186 = arith.mulf %184, %185 : vector<1x16x16xf32>
    %187 = math.exp %186 : vector<1x16x16xf32>
    %cst_76 = arith.constant 8.856000e-03 : f32
    %188 = vector.broadcast %cst_76 : f32 to vector<1x16x16xf32>
    %189 = arith.cmpf ogt, %156, %188 : vector<1x16x16xf32>
    %cst_77 = arith.constant 7.787000e+00 : f32
    %190 = vector.broadcast %cst_77 : f32 to vector<1x16x16xf32>
    %191 = arith.mulf %190, %156 : vector<1x16x16xf32>
    %cst_78 = arith.constant 0.137931034 : f32
    %192 = vector.broadcast %cst_78 : f32 to vector<1x16x16xf32>
    %193 = arith.addf %191, %192 : vector<1x16x16xf32>
    %194 = arith.select %189, %187, %193 : vector<1x16x16xi1>, vector<1x16x16xf32>
    %cst_79 = arith.constant 1.000000e-30 : f32
    %195 = vector.broadcast %cst_79 : f32 to vector<1x16x16xf32>
    %196 = arith.maximumf %168, %195 : vector<1x16x16xf32>
    %197 = math.log %196 : vector<1x16x16xf32>
    %cst_80 = arith.constant 0.333333343 : f32
    %198 = vector.broadcast %cst_80 : f32 to vector<1x16x16xf32>
    %199 = arith.mulf %197, %198 : vector<1x16x16xf32>
    %200 = math.exp %199 : vector<1x16x16xf32>
    %cst_81 = arith.constant 8.856000e-03 : f32
    %201 = vector.broadcast %cst_81 : f32 to vector<1x16x16xf32>
    %202 = arith.cmpf ogt, %168, %201 : vector<1x16x16xf32>
    %cst_82 = arith.constant 7.787000e+00 : f32
    %203 = vector.broadcast %cst_82 : f32 to vector<1x16x16xf32>
    %204 = arith.mulf %203, %168 : vector<1x16x16xf32>
    %cst_83 = arith.constant 0.137931034 : f32
    %205 = vector.broadcast %cst_83 : f32 to vector<1x16x16xf32>
    %206 = arith.addf %204, %205 : vector<1x16x16xf32>
    %207 = arith.select %202, %200, %206 : vector<1x16x16xi1>, vector<1x16x16xf32>
    %cst_84 = arith.constant 8.856000e-03 : f32
    %208 = vector.broadcast %cst_84 : f32 to vector<1x16x16xf32>
    %209 = arith.cmpf ogt, %156, %208 : vector<1x16x16xf32>
    %cst_85 = arith.constant 1.160000e+02 : f32
    %210 = vector.broadcast %cst_85 : f32 to vector<1x16x16xf32>
    %211 = arith.mulf %210, %194 : vector<1x16x16xf32>
    %cst_86 = arith.constant 1.600000e+01 : f32
    %212 = vector.broadcast %cst_86 : f32 to vector<1x16x16xf32>
    %213 = arith.subf %211, %212 : vector<1x16x16xf32>
    %cst_87 = arith.constant 903.299987 : f32
    %214 = vector.broadcast %cst_87 : f32 to vector<1x16x16xf32>
    %215 = arith.mulf %214, %156 : vector<1x16x16xf32>
    %216 = arith.select %209, %213, %215 : vector<1x16x16xi1>, vector<1x16x16xf32>
    %217 = arith.subf %181, %194 : vector<1x16x16xf32>
    %cst_88 = arith.constant 5.000000e+02 : f32
    %218 = vector.broadcast %cst_88 : f32 to vector<1x16x16xf32>
    %219 = arith.mulf %218, %217 : vector<1x16x16xf32>
    %cst_89 = arith.constant 1.280000e+02 : f32
    %220 = vector.broadcast %cst_89 : f32 to vector<1x16x16xf32>
    %221 = arith.addf %219, %220 : vector<1x16x16xf32>
    %222 = arith.subf %194, %207 : vector<1x16x16xf32>
    %cst_90 = arith.constant 2.000000e+02 : f32
    %223 = vector.broadcast %cst_90 : f32 to vector<1x16x16xf32>
    %224 = arith.mulf %223, %222 : vector<1x16x16xf32>
    %cst_91 = arith.constant 1.280000e+02 : f32
    %225 = vector.broadcast %cst_91 : f32 to vector<1x16x16xf32>
    %226 = arith.addf %224, %225 : vector<1x16x16xf32>
    %cst_92 = arith.constant 2.550000e+00 : f32
    %227 = vector.broadcast %cst_92 : f32 to vector<1x16x16xf32>
    %228 = arith.mulf %216, %227 : vector<1x16x16xf32>
    %cst_93 = arith.constant 5.000000e-01 : f32
    %229 = vector.broadcast %cst_93 : f32 to vector<1x16x16xf32>
    %230 = arith.addf %228, %229 : vector<1x16x16xf32>
    %231 = math.floor %230 : vector<1x16x16xf32>
    %cst_94 = arith.constant 0.000000e+00 : f32
    %cst_95 = arith.constant 2.550000e+02 : f32
    %232 = vector.broadcast %cst_94 : f32 to vector<1x16x16xf32>
    %233 = arith.maximumf %232, %231 : vector<1x16x16xf32>
    %234 = vector.broadcast %cst_95 : f32 to vector<1x16x16xf32>
    %235 = arith.minimumf %234, %233 : vector<1x16x16xf32>
    %cst_96 = arith.constant 5.000000e-01 : f32
    %236 = vector.broadcast %cst_96 : f32 to vector<1x16x16xf32>
    %237 = arith.addf %221, %236 : vector<1x16x16xf32>
    %238 = math.floor %237 : vector<1x16x16xf32>
    %cst_97 = arith.constant 0.000000e+00 : f32
    %cst_98 = arith.constant 2.550000e+02 : f32
    %239 = vector.broadcast %cst_97 : f32 to vector<1x16x16xf32>
    %240 = arith.maximumf %239, %238 : vector<1x16x16xf32>
    %241 = vector.broadcast %cst_98 : f32 to vector<1x16x16xf32>
    %242 = arith.minimumf %241, %240 : vector<1x16x16xf32>
    %cst_99 = arith.constant 5.000000e-01 : f32
    %243 = vector.broadcast %cst_99 : f32 to vector<1x16x16xf32>
    %244 = arith.addf %226, %243 : vector<1x16x16xf32>
    %245 = math.floor %244 : vector<1x16x16xf32>
    %cst_100 = arith.constant 0.000000e+00 : f32
    %cst_101 = arith.constant 2.550000e+02 : f32
    %246 = vector.broadcast %cst_100 : f32 to vector<1x16x16xf32>
    %247 = arith.maximumf %246, %245 : vector<1x16x16xf32>
    %248 = vector.broadcast %cst_101 : f32 to vector<1x16x16xf32>
    %249 = arith.minimumf %248, %247 : vector<1x16x16xf32>
    %250 = arith.subf %111, %235 : vector<1x16x16xf32>
    %251 = arith.subf %118, %242 : vector<1x16x16xf32>
    %252 = arith.subf %125, %249 : vector<1x16x16xf32>
    %cst_102 = arith.constant 0.000000e+00 : f32
    %253 = vector.broadcast %cst_102 : f32 to vector<1x30x16xf32>
    %c0_103 = arith.constant 0 : index
    %c0_104 = arith.constant 0 : index
    %c0_105 = arith.constant 0 : index
    %254 = vector.load %arg4[%c0_103, %c0_104, %c0_105] : memref<1x30x16xf32, #tpu.memory_space<vmem>>, vector<1x30x16xf32>
    tpu.vector_store %arg4[%c0_103, %c0_104, %c0_105], %253 {strides = array<i32>} : memref<1x30x16xf32, #tpu.memory_space<vmem>>, vector<1x30x16xf32>,
    %cst_106 = arith.constant 0.000000e+00 : f32
    %255 = vector.broadcast %cst_106 : f32 to vector<1x16x30xf32>
    %c0_107 = arith.constant 0 : index
    %c0_108 = arith.constant 0 : index
    %c0_109 = arith.constant 0 : index
    %256 = vector.load %arg5[%c0_107, %c0_108, %c0_109] : memref<1x16x30xf32, #tpu.memory_space<vmem>>, vector<1x16x30xf32>
    tpu.vector_store %arg5[%c0_107, %c0_108, %c0_109], %255 {strides = array<i32>} : memref<1x16x30xf32, #tpu.memory_space<vmem>>, vector<1x16x30xf32>,
    %cst_110 = arith.constant 0.000000e+00 : f32
    %257 = vector.broadcast %cst_110 : f32 to vector<1x16x16xf32>
    %c0_111 = arith.constant 0 : index
    %c7 = arith.constant 7 : index
    %c0_112 = arith.constant 0 : index
    %258 = vector.load %arg4[%c0_111, %c7, %c0_112] : memref<1x30x16xf32, #tpu.memory_space<vmem>>, vector<1x16x16xf32>
    tpu.vector_store %arg4[%c0_111, %c7, %c0_112], %250 {strides = array<i32>} : memref<1x30x16xf32, #tpu.memory_space<vmem>>, vector<1x16x16xf32>,
    %c0_113 = arith.constant 0 : index
    %c0_114 = arith.constant 0 : index
    %c0_115 = arith.constant 0 : index
    %259 = vector.load %arg4[%c0_113, %c0_114, %c0_115] : memref<1x30x16xf32, #tpu.memory_space<vmem>>, vector<1x16x16xf32>
    %c0_116 = arith.constant 0 : index
    %c1 = arith.constant 1 : index
    %c0_117 = arith.constant 0 : index
    %260 = vector.load %arg4[%c0_116, %c1, %c0_117] : memref<1x30x16xf32, #tpu.memory_space<vmem>>, vector<1x16x16xf32>
    %261 = arith.addf %259, %260 : vector<1x16x16xf32>
    %c0_118 = arith.constant 0 : index
    %c2 = arith.constant 2 : index
    %c0_119 = arith.constant 0 : index
    %262 = vector.load %arg4[%c0_118, %c2, %c0_119] : memref<1x30x16xf32, #tpu.memory_space<vmem>>, vector<1x16x16xf32>
    %263 = arith.addf %261, %262 : vector<1x16x16xf32>
    %c0_120 = arith.constant 0 : index
    %c3 = arith.constant 3 : index
    %c0_121 = arith.constant 0 : index
    %264 = vector.load %arg4[%c0_120, %c3, %c0_121] : memref<1x30x16xf32, #tpu.memory_space<vmem>>, vector<1x16x16xf32>
    %265 = arith.addf %263, %264 : vector<1x16x16xf32>
    %c0_122 = arith.constant 0 : index
    %c4 = arith.constant 4 : index
    %c0_123 = arith.constant 0 : index
    %266 = vector.load %arg4[%c0_122, %c4, %c0_123] : memref<1x30x16xf32, #tpu.memory_space<vmem>>, vector<1x16x16xf32>
    %267 = arith.addf %265, %266 : vector<1x16x16xf32>
    %c0_124 = arith.constant 0 : index
    %c5 = arith.constant 5 : index
    %c0_125 = arith.constant 0 : index
    %268 = vector.load %arg4[%c0_124, %c5, %c0_125] : memref<1x30x16xf32, #tpu.memory_space<vmem>>, vector<1x16x16xf32>
    %269 = arith.addf %267, %268 : vector<1x16x16xf32>
    %c0_126 = arith.constant 0 : index
    %c6 = arith.constant 6 : index
    %c0_127 = arith.constant 0 : index
    %270 = vector.load %arg4[%c0_126, %c6, %c0_127] : memref<1x30x16xf32, #tpu.memory_space<vmem>>, vector<1x16x16xf32>
    %271 = arith.addf %269, %270 : vector<1x16x16xf32>
    %c0_128 = arith.constant 0 : index
    %c7_129 = arith.constant 7 : index
    %c0_130 = arith.constant 0 : index
    %272 = vector.load %arg4[%c0_128, %c7_129, %c0_130] : memref<1x30x16xf32, #tpu.memory_space<vmem>>, vector<1x16x16xf32>
    %273 = arith.addf %271, %272 : vector<1x16x16xf32>
    %c0_131 = arith.constant 0 : index
    %c8 = arith.constant 8 : index
    %c0_132 = arith.constant 0 : index
    %274 = vector.load %arg4[%c0_131, %c8, %c0_132] : memref<1x30x16xf32, #tpu.memory_space<vmem>>, vector<1x16x16xf32>
    %275 = arith.addf %273, %274 : vector<1x16x16xf32>
    %c0_133 = arith.constant 0 : index
    %c9 = arith.constant 9 : index
    %c0_134 = arith.constant 0 : index
    %276 = vector.load %arg4[%c0_133, %c9, %c0_134] : memref<1x30x16xf32, #tpu.memory_space<vmem>>, vector<1x16x16xf32>
    %277 = arith.addf %275, %276 : vector<1x16x16xf32>
    %c0_135 = arith.constant 0 : index
    %c10 = arith.constant 10 : index
    %c0_136 = arith.constant 0 : index
    %278 = vector.load %arg4[%c0_135, %c10, %c0_136] : memref<1x30x16xf32, #tpu.memory_space<vmem>>, vector<1x16x16xf32>
    %279 = arith.addf %277, %278 : vector<1x16x16xf32>
    %c0_137 = arith.constant 0 : index
    %c11 = arith.constant 11 : index
    %c0_138 = arith.constant 0 : index
    %280 = vector.load %arg4[%c0_137, %c11, %c0_138] : memref<1x30x16xf32, #tpu.memory_space<vmem>>, vector<1x16x16xf32>
    %281 = arith.addf %279, %280 : vector<1x16x16xf32>
    %c0_139 = arith.constant 0 : index
    %c12 = arith.constant 12 : index
    %c0_140 = arith.constant 0 : index
    %282 = vector.load %arg4[%c0_139, %c12, %c0_140] : memref<1x30x16xf32, #tpu.memory_space<vmem>>, vector<1x16x16xf32>
    %283 = arith.addf %281, %282 : vector<1x16x16xf32>
    %c0_141 = arith.constant 0 : index
    %c13 = arith.constant 13 : index
    %c0_142 = arith.constant 0 : index
    %284 = vector.load %arg4[%c0_141, %c13, %c0_142] : memref<1x30x16xf32, #tpu.memory_space<vmem>>, vector<1x16x16xf32>
    %285 = arith.addf %283, %284 : vector<1x16x16xf32>
    %c0_143 = arith.constant 0 : index
    %c14 = arith.constant 14 : index
    %c0_144 = arith.constant 0 : index
    %286 = vector.load %arg4[%c0_143, %c14, %c0_144] : memref<1x30x16xf32, #tpu.memory_space<vmem>>, vector<1x16x16xf32>
    %287 = arith.addf %285, %286 : vector<1x16x16xf32>
    %c0_145 = arith.constant 0 : index
    %c0_146 = arith.constant 0 : index
    %c7_147 = arith.constant 7 : index
    %288 = vector.load %arg5[%c0_145, %c0_146, %c7_147] : memref<1x16x30xf32, #tpu.memory_space<vmem>>, vector<1x16x16xf32>
    tpu.vector_store %arg5[%c0_145, %c0_146, %c7_147], %287 {strides = array<i32>} : memref<1x16x30xf32, #tpu.memory_space<vmem>>, vector<1x16x16xf32>,
    %c0_148 = arith.constant 0 : index
    %c0_149 = arith.constant 0 : index
    %c0_150 = arith.constant 0 : index
    %289 = vector.load %arg5[%c0_148, %c0_149, %c0_150] : memref<1x16x30xf32, #tpu.memory_space<vmem>>, vector<1x16x16xf32>
    %c0_151 = arith.constant 0 : index
    %c0_152 = arith.constant 0 : index
    %c1_153 = arith.constant 1 : index
    %290 = vector.load %arg5[%c0_151, %c0_152, %c1_153] : memref<1x16x30xf32, #tpu.memory_space<vmem>>, vector<1x16x16xf32>
    %291 = arith.addf %289, %290 : vector<1x16x16xf32>
    %c0_154 = arith.constant 0 : index
    %c0_155 = arith.constant 0 : index
    %c2_156 = arith.constant 2 : index
    %292 = vector.load %arg5[%c0_154, %c0_155, %c2_156] : memref<1x16x30xf32, #tpu.memory_space<vmem>>, vector<1x16x16xf32>
    %293 = arith.addf %291, %292 : vector<1x16x16xf32>
    %c0_157 = arith.constant 0 : index
    %c0_158 = arith.constant 0 : index
    %c3_159 = arith.constant 3 : index
    %294 = vector.load %arg5[%c0_157, %c0_158, %c3_159] : memref<1x16x30xf32, #tpu.memory_space<vmem>>, vector<1x16x16xf32>
    %295 = arith.addf %293, %294 : vector<1x16x16xf32>
    %c0_160 = arith.constant 0 : index
    %c0_161 = arith.constant 0 : index
    %c4_162 = arith.constant 4 : index
    %296 = vector.load %arg5[%c0_160, %c0_161, %c4_162] : memref<1x16x30xf32, #tpu.memory_space<vmem>>, vector<1x16x16xf32>
    %297 = arith.addf %295, %296 : vector<1x16x16xf32>
    %c0_163 = arith.constant 0 : index
    %c0_164 = arith.constant 0 : index
    %c5_165 = arith.constant 5 : index
    %298 = vector.load %arg5[%c0_163, %c0_164, %c5_165] : memref<1x16x30xf32, #tpu.memory_space<vmem>>, vector<1x16x16xf32>
    %299 = arith.addf %297, %298 : vector<1x16x16xf32>
    %c0_166 = arith.constant 0 : index
    %c0_167 = arith.constant 0 : index
    %c6_168 = arith.constant 6 : index
    %300 = vector.load %arg5[%c0_166, %c0_167, %c6_168] : memref<1x16x30xf32, #tpu.memory_space<vmem>>, vector<1x16x16xf32>
    %301 = arith.addf %299, %300 : vector<1x16x16xf32>
    %c0_169 = arith.constant 0 : index
    %c0_170 = arith.constant 0 : index
    %c7_171 = arith.constant 7 : index
    %302 = vector.load %arg5[%c0_169, %c0_170, %c7_171] : memref<1x16x30xf32, #tpu.memory_space<vmem>>, vector<1x16x16xf32>
    %303 = arith.addf %301, %302 : vector<1x16x16xf32>
    %c0_172 = arith.constant 0 : index
    %c0_173 = arith.constant 0 : index
    %c8_174 = arith.constant 8 : index
    %304 = vector.load %arg5[%c0_172, %c0_173, %c8_174] : memref<1x16x30xf32, #tpu.memory_space<vmem>>, vector<1x16x16xf32>
    %305 = arith.addf %303, %304 : vector<1x16x16xf32>
    %c0_175 = arith.constant 0 : index
    %c0_176 = arith.constant 0 : index
    %c9_177 = arith.constant 9 : index
    %306 = vector.load %arg5[%c0_175, %c0_176, %c9_177] : memref<1x16x30xf32, #tpu.memory_space<vmem>>, vector<1x16x16xf32>
    %307 = arith.addf %305, %306 : vector<1x16x16xf32>
    %c0_178 = arith.constant 0 : index
    %c0_179 = arith.constant 0 : index
    %c10_180 = arith.constant 10 : index
    %308 = vector.load %arg5[%c0_178, %c0_179, %c10_180] : memref<1x16x30xf32, #tpu.memory_space<vmem>>, vector<1x16x16xf32>
    %309 = arith.addf %307, %308 : vector<1x16x16xf32>
    %c0_181 = arith.constant 0 : index
    %c0_182 = arith.constant 0 : index
    %c11_183 = arith.constant 11 : index
    %310 = vector.load %arg5[%c0_181, %c0_182, %c11_183] : memref<1x16x30xf32, #tpu.memory_space<vmem>>, vector<1x16x16xf32>
    %311 = arith.addf %309, %310 : vector<1x16x16xf32>
    %c0_184 = arith.constant 0 : index
    %c0_185 = arith.constant 0 : index
    %c12_186 = arith.constant 12 : index
    %312 = vector.load %arg5[%c0_184, %c0_185, %c12_186] : memref<1x16x30xf32, #tpu.memory_space<vmem>>, vector<1x16x16xf32>
    %313 = arith.addf %311, %312 : vector<1x16x16xf32>
    %c0_187 = arith.constant 0 : index
    %c0_188 = arith.constant 0 : index
    %c13_189 = arith.constant 13 : index
    %314 = vector.load %arg5[%c0_187, %c0_188, %c13_189] : memref<1x16x30xf32, #tpu.memory_space<vmem>>, vector<1x16x16xf32>
    %315 = arith.addf %313, %314 : vector<1x16x16xf32>
    %c0_190 = arith.constant 0 : index
    %c0_191 = arith.constant 0 : index
    %c14_192 = arith.constant 14 : index
    %316 = vector.load %arg5[%c0_190, %c0_191, %c14_192] : memref<1x16x30xf32, #tpu.memory_space<vmem>>, vector<1x16x16xf32>
    %317 = arith.addf %315, %316 : vector<1x16x16xf32>
    %318 = arith.mulf %317, %317 : vector<1x16x16xf32>
    %319 = arith.addf %257, %318 : vector<1x16x16xf32>
    %c0_193 = arith.constant 0 : index
    %c7_194 = arith.constant 7 : index
    %c0_195 = arith.constant 0 : index
    %320 = vector.load %arg4[%c0_193, %c7_194, %c0_195] : memref<1x30x16xf32, #tpu.memory_space<vmem>>, vector<1x16x16xf32>
    tpu.vector_store %arg4[%c0_193, %c7_194, %c0_195], %251 {strides = array<i32>} : memref<1x30x16xf32, #tpu.memory_space<vmem>>, vector<1x16x16xf32>,
    %c0_196 = arith.constant 0 : index
    %c0_197 = arith.constant 0 : index
    %c0_198 = arith.constant 0 : index
    %321 = vector.load %arg4[%c0_196, %c0_197, %c0_198] : memref<1x30x16xf32, #tpu.memory_space<vmem>>, vector<1x16x16xf32>
    %c0_199 = arith.constant 0 : index
    %c1_200 = arith.constant 1 : index
    %c0_201 = arith.constant 0 : index
    %322 = vector.load %arg4[%c0_199, %c1_200, %c0_201] : memref<1x30x16xf32, #tpu.memory_space<vmem>>, vector<1x16x16xf32>
    %323 = arith.addf %321, %322 : vector<1x16x16xf32>
    %c0_202 = arith.constant 0 : index
    %c2_203 = arith.constant 2 : index
    %c0_204 = arith.constant 0 : index
    %324 = vector.load %arg4[%c0_202, %c2_203, %c0_204] : memref<1x30x16xf32, #tpu.memory_space<vmem>>, vector<1x16x16xf32>
    %325 = arith.addf %323, %324 : vector<1x16x16xf32>
    %c0_205 = arith.constant 0 : index
    %c3_206 = arith.constant 3 : index
    %c0_207 = arith.constant 0 : index
    %326 = vector.load %arg4[%c0_205, %c3_206, %c0_207] : memref<1x30x16xf32, #tpu.memory_space<vmem>>, vector<1x16x16xf32>
    %327 = arith.addf %325, %326 : vector<1x16x16xf32>
    %c0_208 = arith.constant 0 : index
    %c4_209 = arith.constant 4 : index
    %c0_210 = arith.constant 0 : index
    %328 = vector.load %arg4[%c0_208, %c4_209, %c0_210] : memref<1x30x16xf32, #tpu.memory_space<vmem>>, vector<1x16x16xf32>
    %329 = arith.addf %327, %328 : vector<1x16x16xf32>
    %c0_211 = arith.constant 0 : index
    %c5_212 = arith.constant 5 : index
    %c0_213 = arith.constant 0 : index
    %330 = vector.load %arg4[%c0_211, %c5_212, %c0_213] : memref<1x30x16xf32, #tpu.memory_space<vmem>>, vector<1x16x16xf32>
    %331 = arith.addf %329, %330 : vector<1x16x16xf32>
    %c0_214 = arith.constant 0 : index
    %c6_215 = arith.constant 6 : index
    %c0_216 = arith.constant 0 : index
    %332 = vector.load %arg4[%c0_214, %c6_215, %c0_216] : memref<1x30x16xf32, #tpu.memory_space<vmem>>, vector<1x16x16xf32>
    %333 = arith.addf %331, %332 : vector<1x16x16xf32>
    %c0_217 = arith.constant 0 : index
    %c7_218 = arith.constant 7 : index
    %c0_219 = arith.constant 0 : index
    %334 = vector.load %arg4[%c0_217, %c7_218, %c0_219] : memref<1x30x16xf32, #tpu.memory_space<vmem>>, vector<1x16x16xf32>
    %335 = arith.addf %333, %334 : vector<1x16x16xf32>
    %c0_220 = arith.constant 0 : index
    %c8_221 = arith.constant 8 : index
    %c0_222 = arith.constant 0 : index
    %336 = vector.load %arg4[%c0_220, %c8_221, %c0_222] : memref<1x30x16xf32, #tpu.memory_space<vmem>>, vector<1x16x16xf32>
    %337 = arith.addf %335, %336 : vector<1x16x16xf32>
    %c0_223 = arith.constant 0 : index
    %c9_224 = arith.constant 9 : index
    %c0_225 = arith.constant 0 : index
    %338 = vector.load %arg4[%c0_223, %c9_224, %c0_225] : memref<1x30x16xf32, #tpu.memory_space<vmem>>, vector<1x16x16xf32>
    %339 = arith.addf %337, %338 : vector<1x16x16xf32>
    %c0_226 = arith.constant 0 : index
    %c10_227 = arith.constant 10 : index
    %c0_228 = arith.constant 0 : index
    %340 = vector.load %arg4[%c0_226, %c10_227, %c0_228] : memref<1x30x16xf32, #tpu.memory_space<vmem>>, vector<1x16x16xf32>
    %341 = arith.addf %339, %340 : vector<1x16x16xf32>
    %c0_229 = arith.constant 0 : index
    %c11_230 = arith.constant 11 : index
    %c0_231 = arith.constant 0 : index
    %342 = vector.load %arg4[%c0_229, %c11_230, %c0_231] : memref<1x30x16xf32, #tpu.memory_space<vmem>>, vector<1x16x16xf32>
    %343 = arith.addf %341, %342 : vector<1x16x16xf32>
    %c0_232 = arith.constant 0 : index
    %c12_233 = arith.constant 12 : index
    %c0_234 = arith.constant 0 : index
    %344 = vector.load %arg4[%c0_232, %c12_233, %c0_234] : memref<1x30x16xf32, #tpu.memory_space<vmem>>, vector<1x16x16xf32>
    %345 = arith.addf %343, %344 : vector<1x16x16xf32>
    %c0_235 = arith.constant 0 : index
    %c13_236 = arith.constant 13 : index
    %c0_237 = arith.constant 0 : index
    %346 = vector.load %arg4[%c0_235, %c13_236, %c0_237] : memref<1x30x16xf32, #tpu.memory_space<vmem>>, vector<1x16x16xf32>
    %347 = arith.addf %345, %346 : vector<1x16x16xf32>
    %c0_238 = arith.constant 0 : index
    %c14_239 = arith.constant 14 : index
    %c0_240 = arith.constant 0 : index
    %348 = vector.load %arg4[%c0_238, %c14_239, %c0_240] : memref<1x30x16xf32, #tpu.memory_space<vmem>>, vector<1x16x16xf32>
    %349 = arith.addf %347, %348 : vector<1x16x16xf32>
    %c0_241 = arith.constant 0 : index
    %c0_242 = arith.constant 0 : index
    %c7_243 = arith.constant 7 : index
    %350 = vector.load %arg5[%c0_241, %c0_242, %c7_243] : memref<1x16x30xf32, #tpu.memory_space<vmem>>, vector<1x16x16xf32>
    tpu.vector_store %arg5[%c0_241, %c0_242, %c7_243], %349 {strides = array<i32>} : memref<1x16x30xf32, #tpu.memory_space<vmem>>, vector<1x16x16xf32>,
    %c0_244 = arith.constant 0 : index
    %c0_245 = arith.constant 0 : index
    %c0_246 = arith.constant 0 : index
    %351 = vector.load %arg5[%c0_244, %c0_245, %c0_246] : memref<1x16x30xf32, #tpu.memory_space<vmem>>, vector<1x16x16xf32>
    %c0_247 = arith.constant 0 : index
    %c0_248 = arith.constant 0 : index
    %c1_249 = arith.constant 1 : index
    %352 = vector.load %arg5[%c0_247, %c0_248, %c1_249] : memref<1x16x30xf32, #tpu.memory_space<vmem>>, vector<1x16x16xf32>
    %353 = arith.addf %351, %352 : vector<1x16x16xf32>
    %c0_250 = arith.constant 0 : index
    %c0_251 = arith.constant 0 : index
    %c2_252 = arith.constant 2 : index
    %354 = vector.load %arg5[%c0_250, %c0_251, %c2_252] : memref<1x16x30xf32, #tpu.memory_space<vmem>>, vector<1x16x16xf32>
    %355 = arith.addf %353, %354 : vector<1x16x16xf32>
    %c0_253 = arith.constant 0 : index
    %c0_254 = arith.constant 0 : index
    %c3_255 = arith.constant 3 : index
    %356 = vector.load %arg5[%c0_253, %c0_254, %c3_255] : memref<1x16x30xf32, #tpu.memory_space<vmem>>, vector<1x16x16xf32>
    %357 = arith.addf %355, %356 : vector<1x16x16xf32>
    %c0_256 = arith.constant 0 : index
    %c0_257 = arith.constant 0 : index
    %c4_258 = arith.constant 4 : index
    %358 = vector.load %arg5[%c0_256, %c0_257, %c4_258] : memref<1x16x30xf32, #tpu.memory_space<vmem>>, vector<1x16x16xf32>
    %359 = arith.addf %357, %358 : vector<1x16x16xf32>
    %c0_259 = arith.constant 0 : index
    %c0_260 = arith.constant 0 : index
    %c5_261 = arith.constant 5 : index
    %360 = vector.load %arg5[%c0_259, %c0_260, %c5_261] : memref<1x16x30xf32, #tpu.memory_space<vmem>>, vector<1x16x16xf32>
    %361 = arith.addf %359, %360 : vector<1x16x16xf32>
    %c0_262 = arith.constant 0 : index
    %c0_263 = arith.constant 0 : index
    %c6_264 = arith.constant 6 : index
    %362 = vector.load %arg5[%c0_262, %c0_263, %c6_264] : memref<1x16x30xf32, #tpu.memory_space<vmem>>, vector<1x16x16xf32>
    %363 = arith.addf %361, %362 : vector<1x16x16xf32>
    %c0_265 = arith.constant 0 : index
    %c0_266 = arith.constant 0 : index
    %c7_267 = arith.constant 7 : index
    %364 = vector.load %arg5[%c0_265, %c0_266, %c7_267] : memref<1x16x30xf32, #tpu.memory_space<vmem>>, vector<1x16x16xf32>
    %365 = arith.addf %363, %364 : vector<1x16x16xf32>
    %c0_268 = arith.constant 0 : index
    %c0_269 = arith.constant 0 : index
    %c8_270 = arith.constant 8 : index
    %366 = vector.load %arg5[%c0_268, %c0_269, %c8_270] : memref<1x16x30xf32, #tpu.memory_space<vmem>>, vector<1x16x16xf32>
    %367 = arith.addf %365, %366 : vector<1x16x16xf32>
    %c0_271 = arith.constant 0 : index
    %c0_272 = arith.constant 0 : index
    %c9_273 = arith.constant 9 : index
    %368 = vector.load %arg5[%c0_271, %c0_272, %c9_273] : memref<1x16x30xf32, #tpu.memory_space<vmem>>, vector<1x16x16xf32>
    %369 = arith.addf %367, %368 : vector<1x16x16xf32>
    %c0_274 = arith.constant 0 : index
    %c0_275 = arith.constant 0 : index
    %c10_276 = arith.constant 10 : index
    %370 = vector.load %arg5[%c0_274, %c0_275, %c10_276] : memref<1x16x30xf32, #tpu.memory_space<vmem>>, vector<1x16x16xf32>
    %371 = arith.addf %369, %370 : vector<1x16x16xf32>
    %c0_277 = arith.constant 0 : index
    %c0_278 = arith.constant 0 : index
    %c11_279 = arith.constant 11 : index
    %372 = vector.load %arg5[%c0_277, %c0_278, %c11_279] : memref<1x16x30xf32, #tpu.memory_space<vmem>>, vector<1x16x16xf32>
    %373 = arith.addf %371, %372 : vector<1x16x16xf32>
    %c0_280 = arith.constant 0 : index
    %c0_281 = arith.constant 0 : index
    %c12_282 = arith.constant 12 : index
    %374 = vector.load %arg5[%c0_280, %c0_281, %c12_282] : memref<1x16x30xf32, #tpu.memory_space<vmem>>, vector<1x16x16xf32>
    %375 = arith.addf %373, %374 : vector<1x16x16xf32>
    %c0_283 = arith.constant 0 : index
    %c0_284 = arith.constant 0 : index
    %c13_285 = arith.constant 13 : index
    %376 = vector.load %arg5[%c0_283, %c0_284, %c13_285] : memref<1x16x30xf32, #tpu.memory_space<vmem>>, vector<1x16x16xf32>
    %377 = arith.addf %375, %376 : vector<1x16x16xf32>
    %c0_286 = arith.constant 0 : index
    %c0_287 = arith.constant 0 : index
    %c14_288 = arith.constant 14 : index
    %378 = vector.load %arg5[%c0_286, %c0_287, %c14_288] : memref<1x16x30xf32, #tpu.memory_space<vmem>>, vector<1x16x16xf32>
    %379 = arith.addf %377, %378 : vector<1x16x16xf32>
    %380 = arith.mulf %379, %379 : vector<1x16x16xf32>
    %381 = arith.addf %319, %380 : vector<1x16x16xf32>
    %c0_289 = arith.constant 0 : index
    %c7_290 = arith.constant 7 : index
    %c0_291 = arith.constant 0 : index
    %382 = vector.load %arg4[%c0_289, %c7_290, %c0_291] : memref<1x30x16xf32, #tpu.memory_space<vmem>>, vector<1x16x16xf32>
    tpu.vector_store %arg4[%c0_289, %c7_290, %c0_291], %252 {strides = array<i32>} : memref<1x30x16xf32, #tpu.memory_space<vmem>>, vector<1x16x16xf32>,
    %c0_292 = arith.constant 0 : index
    %c0_293 = arith.constant 0 : index
    %c0_294 = arith.constant 0 : index
    %383 = vector.load %arg4[%c0_292, %c0_293, %c0_294] : memref<1x30x16xf32, #tpu.memory_space<vmem>>, vector<1x16x16xf32>
    %c0_295 = arith.constant 0 : index
    %c1_296 = arith.constant 1 : index
    %c0_297 = arith.constant 0 : index
    %384 = vector.load %arg4[%c0_295, %c1_296, %c0_297] : memref<1x30x16xf32, #tpu.memory_space<vmem>>, vector<1x16x16xf32>
    %385 = arith.addf %383, %384 : vector<1x16x16xf32>
    %c0_298 = arith.constant 0 : index
    %c2_299 = arith.constant 2 : index
    %c0_300 = arith.constant 0 : index
    %386 = vector.load %arg4[%c0_298, %c2_299, %c0_300] : memref<1x30x16xf32, #tpu.memory_space<vmem>>, vector<1x16x16xf32>
    %387 = arith.addf %385, %386 : vector<1x16x16xf32>
    %c0_301 = arith.constant 0 : index
    %c3_302 = arith.constant 3 : index
    %c0_303 = arith.constant 0 : index
    %388 = vector.load %arg4[%c0_301, %c3_302, %c0_303] : memref<1x30x16xf32, #tpu.memory_space<vmem>>, vector<1x16x16xf32>
    %389 = arith.addf %387, %388 : vector<1x16x16xf32>
    %c0_304 = arith.constant 0 : index
    %c4_305 = arith.constant 4 : index
    %c0_306 = arith.constant 0 : index
    %390 = vector.load %arg4[%c0_304, %c4_305, %c0_306] : memref<1x30x16xf32, #tpu.memory_space<vmem>>, vector<1x16x16xf32>
    %391 = arith.addf %389, %390 : vector<1x16x16xf32>
    %c0_307 = arith.constant 0 : index
    %c5_308 = arith.constant 5 : index
    %c0_309 = arith.constant 0 : index
    %392 = vector.load %arg4[%c0_307, %c5_308, %c0_309] : memref<1x30x16xf32, #tpu.memory_space<vmem>>, vector<1x16x16xf32>
    %393 = arith.addf %391, %392 : vector<1x16x16xf32>
    %c0_310 = arith.constant 0 : index
    %c6_311 = arith.constant 6 : index
    %c0_312 = arith.constant 0 : index
    %394 = vector.load %arg4[%c0_310, %c6_311, %c0_312] : memref<1x30x16xf32, #tpu.memory_space<vmem>>, vector<1x16x16xf32>
    %395 = arith.addf %393, %394 : vector<1x16x16xf32>
    %c0_313 = arith.constant 0 : index
    %c7_314 = arith.constant 7 : index
    %c0_315 = arith.constant 0 : index
    %396 = vector.load %arg4[%c0_313, %c7_314, %c0_315] : memref<1x30x16xf32, #tpu.memory_space<vmem>>, vector<1x16x16xf32>
    %397 = arith.addf %395, %396 : vector<1x16x16xf32>
    %c0_316 = arith.constant 0 : index
    %c8_317 = arith.constant 8 : index
    %c0_318 = arith.constant 0 : index
    %398 = vector.load %arg4[%c0_316, %c8_317, %c0_318] : memref<1x30x16xf32, #tpu.memory_space<vmem>>, vector<1x16x16xf32>
    %399 = arith.addf %397, %398 : vector<1x16x16xf32>
    %c0_319 = arith.constant 0 : index
    %c9_320 = arith.constant 9 : index
    %c0_321 = arith.constant 0 : index
    %400 = vector.load %arg4[%c0_319, %c9_320, %c0_321] : memref<1x30x16xf32, #tpu.memory_space<vmem>>, vector<1x16x16xf32>
    %401 = arith.addf %399, %400 : vector<1x16x16xf32>
    %c0_322 = arith.constant 0 : index
    %c10_323 = arith.constant 10 : index
    %c0_324 = arith.constant 0 : index
    %402 = vector.load %arg4[%c0_322, %c10_323, %c0_324] : memref<1x30x16xf32, #tpu.memory_space<vmem>>, vector<1x16x16xf32>
    %403 = arith.addf %401, %402 : vector<1x16x16xf32>
    %c0_325 = arith.constant 0 : index
    %c11_326 = arith.constant 11 : index
    %c0_327 = arith.constant 0 : index
    %404 = vector.load %arg4[%c0_325, %c11_326, %c0_327] : memref<1x30x16xf32, #tpu.memory_space<vmem>>, vector<1x16x16xf32>
    %405 = arith.addf %403, %404 : vector<1x16x16xf32>
    %c0_328 = arith.constant 0 : index
    %c12_329 = arith.constant 12 : index
    %c0_330 = arith.constant 0 : index
    %406 = vector.load %arg4[%c0_328, %c12_329, %c0_330] : memref<1x30x16xf32, #tpu.memory_space<vmem>>, vector<1x16x16xf32>
    %407 = arith.addf %405, %406 : vector<1x16x16xf32>
    %c0_331 = arith.constant 0 : index
    %c13_332 = arith.constant 13 : index
    %c0_333 = arith.constant 0 : index
    %408 = vector.load %arg4[%c0_331, %c13_332, %c0_333] : memref<1x30x16xf32, #tpu.memory_space<vmem>>, vector<1x16x16xf32>
    %409 = arith.addf %407, %408 : vector<1x16x16xf32>
    %c0_334 = arith.constant 0 : index
    %c14_335 = arith.constant 14 : index
    %c0_336 = arith.constant 0 : index
    %410 = vector.load %arg4[%c0_334, %c14_335, %c0_336] : memref<1x30x16xf32, #tpu.memory_space<vmem>>, vector<1x16x16xf32>
    %411 = arith.addf %409, %410 : vector<1x16x16xf32>
    %c0_337 = arith.constant 0 : index
    %c0_338 = arith.constant 0 : index
    %c7_339 = arith.constant 7 : index
    %412 = vector.load %arg5[%c0_337, %c0_338, %c7_339] : memref<1x16x30xf32, #tpu.memory_space<vmem>>, vector<1x16x16xf32>
    tpu.vector_store %arg5[%c0_337, %c0_338, %c7_339], %411 {strides = array<i32>} : memref<1x16x30xf32, #tpu.memory_space<vmem>>, vector<1x16x16xf32>,
    %c0_340 = arith.constant 0 : index
    %c0_341 = arith.constant 0 : index
    %c0_342 = arith.constant 0 : index
    %413 = vector.load %arg5[%c0_340, %c0_341, %c0_342] : memref<1x16x30xf32, #tpu.memory_space<vmem>>, vector<1x16x16xf32>
    %c0_343 = arith.constant 0 : index
    %c0_344 = arith.constant 0 : index
    %c1_345 = arith.constant 1 : index
    %414 = vector.load %arg5[%c0_343, %c0_344, %c1_345] : memref<1x16x30xf32, #tpu.memory_space<vmem>>, vector<1x16x16xf32>
    %415 = arith.addf %413, %414 : vector<1x16x16xf32>
    %c0_346 = arith.constant 0 : index
    %c0_347 = arith.constant 0 : index
    %c2_348 = arith.constant 2 : index
    %416 = vector.load %arg5[%c0_346, %c0_347, %c2_348] : memref<1x16x30xf32, #tpu.memory_space<vmem>>, vector<1x16x16xf32>
    %417 = arith.addf %415, %416 : vector<1x16x16xf32>
    %c0_349 = arith.constant 0 : index
    %c0_350 = arith.constant 0 : index
    %c3_351 = arith.constant 3 : index
    %418 = vector.load %arg5[%c0_349, %c0_350, %c3_351] : memref<1x16x30xf32, #tpu.memory_space<vmem>>, vector<1x16x16xf32>
    %419 = arith.addf %417, %418 : vector<1x16x16xf32>
    %c0_352 = arith.constant 0 : index
    %c0_353 = arith.constant 0 : index
    %c4_354 = arith.constant 4 : index
    %420 = vector.load %arg5[%c0_352, %c0_353, %c4_354] : memref<1x16x30xf32, #tpu.memory_space<vmem>>, vector<1x16x16xf32>
    %421 = arith.addf %419, %420 : vector<1x16x16xf32>
    %c0_355 = arith.constant 0 : index
    %c0_356 = arith.constant 0 : index
    %c5_357 = arith.constant 5 : index
    %422 = vector.load %arg5[%c0_355, %c0_356, %c5_357] : memref<1x16x30xf32, #tpu.memory_space<vmem>>, vector<1x16x16xf32>
    %423 = arith.addf %421, %422 : vector<1x16x16xf32>
    %c0_358 = arith.constant 0 : index
    %c0_359 = arith.constant 0 : index
    %c6_360 = arith.constant 6 : index
    %424 = vector.load %arg5[%c0_358, %c0_359, %c6_360] : memref<1x16x30xf32, #tpu.memory_space<vmem>>, vector<1x16x16xf32>
    %425 = arith.addf %423, %424 : vector<1x16x16xf32>
    %c0_361 = arith.constant 0 : index
    %c0_362 = arith.constant 0 : index
    %c7_363 = arith.constant 7 : index
    %426 = vector.load %arg5[%c0_361, %c0_362, %c7_363] : memref<1x16x30xf32, #tpu.memory_space<vmem>>, vector<1x16x16xf32>
    %427 = arith.addf %425, %426 : vector<1x16x16xf32>
    %c0_364 = arith.constant 0 : index
    %c0_365 = arith.constant 0 : index
    %c8_366 = arith.constant 8 : index
    %428 = vector.load %arg5[%c0_364, %c0_365, %c8_366] : memref<1x16x30xf32, #tpu.memory_space<vmem>>, vector<1x16x16xf32>
    %429 = arith.addf %427, %428 : vector<1x16x16xf32>
    %c0_367 = arith.constant 0 : index
    %c0_368 = arith.constant 0 : index
    %c9_369 = arith.constant 9 : index
    %430 = vector.load %arg5[%c0_367, %c0_368, %c9_369] : memref<1x16x30xf32, #tpu.memory_space<vmem>>, vector<1x16x16xf32>
    %431 = arith.addf %429, %430 : vector<1x16x16xf32>
    %c0_370 = arith.constant 0 : index
    %c0_371 = arith.constant 0 : index
    %c10_372 = arith.constant 10 : index
    %432 = vector.load %arg5[%c0_370, %c0_371, %c10_372] : memref<1x16x30xf32, #tpu.memory_space<vmem>>, vector<1x16x16xf32>
    %433 = arith.addf %431, %432 : vector<1x16x16xf32>
    %c0_373 = arith.constant 0 : index
    %c0_374 = arith.constant 0 : index
    %c11_375 = arith.constant 11 : index
    %434 = vector.load %arg5[%c0_373, %c0_374, %c11_375] : memref<1x16x30xf32, #tpu.memory_space<vmem>>, vector<1x16x16xf32>
    %435 = arith.addf %433, %434 : vector<1x16x16xf32>
    %c0_376 = arith.constant 0 : index
    %c0_377 = arith.constant 0 : index
    %c12_378 = arith.constant 12 : index
    %436 = vector.load %arg5[%c0_376, %c0_377, %c12_378] : memref<1x16x30xf32, #tpu.memory_space<vmem>>, vector<1x16x16xf32>
    %437 = arith.addf %435, %436 : vector<1x16x16xf32>
    %c0_379 = arith.constant 0 : index
    %c0_380 = arith.constant 0 : index
    %c13_381 = arith.constant 13 : index
    %438 = vector.load %arg5[%c0_379, %c0_380, %c13_381] : memref<1x16x30xf32, #tpu.memory_space<vmem>>, vector<1x16x16xf32>
    %439 = arith.addf %437, %438 : vector<1x16x16xf32>
    %c0_382 = arith.constant 0 : index
    %c0_383 = arith.constant 0 : index
    %c14_384 = arith.constant 14 : index
    %440 = vector.load %arg5[%c0_382, %c0_383, %c14_384] : memref<1x16x30xf32, #tpu.memory_space<vmem>>, vector<1x16x16xf32>
    %441 = arith.addf %439, %440 : vector<1x16x16xf32>
    %442 = arith.mulf %441, %441 : vector<1x16x16xf32>
    %443 = arith.addf %381, %442 : vector<1x16x16xf32>
    %444 = vector.shape_cast %443 : vector<1x16x16xf32> to vector<1x1x16x16xf32>
    %cst_385 = arith.constant dense<0.000000e+00> : vector<1xf32>
    %445 = vector.multi_reduction <add>, %444, %cst_385 [1, 2, 3] : vector<1x1x16x16xf32> to vector<1xf32>
    %446 = vector.shape_cast %445 : vector<1xf32> to vector<1x1x1x1xf32>
    %447 = vector.extract %446[0, 0, 0, 0] : f32 from vector<1x1x1x1xf32>
    %448 = vector.broadcast %447 : f32 to vector<1x8x128xf32>
    %c0_386 = arith.constant 0 : index
    %c0_387 = arith.constant 0 : index
    %c0_388 = arith.constant 0 : index
    %449 = vector.load %arg3[%c0_386, %c0_387, %c0_388] : memref<1x8x128xf32, #tpu.memory_space<vmem>>, vector<1x8x128xf32>
    tpu.vector_store %arg3[%c0_386, %c0_387, %c0_388], %448 {strides = array<i32>} : memref<1x8x128xf32, #tpu.memory_space<vmem>>, vector<1x8x128xf32>,
    return
  }
  func.func @transform_0(%arg0: i32) -> (i32, i32, i32, i32) {
    %c0_i32 = arith.constant 0 : i32
    %c0_i32_0 = arith.constant 0 : i32
    %c0_i32_1 = arith.constant 0 : i32
    %c0_i32_2 = arith.constant 0 : i32
    return %arg0, %c0_i32, %c0_i32_0, %c0_i32_1 : i32, i32, i32, i32
  }
  func.func @transform_1(%arg0: i32) -> (i32, i32, i32, i32) {
    %c0_i32 = arith.constant 0 : i32
    %c0_i32_0 = arith.constant 0 : i32
    %c0_i32_1 = arith.constant 0 : i32
    %c0_i32_2 = arith.constant 0 : i32
    return %arg0, %c0_i32, %c0_i32_0, %c0_i32_1 : i32, i32, i32, i32
  }
  func.func @transform_2(%arg0: i32) -> (i32, i32, i32) {
    %c0_i32 = arith.constant 0 : i32
    %c0_i32_0 = arith.constant 0 : i32
    %c0_i32_1 = arith.constant 0 : i32
    return %arg0, %c0_i32, %c0_i32_0 : i32, i32, i32
  }
}

</mosaic_0001>

<bundles_post_ra>
// kernel: tpu_custom_call.1
= control target key start
LH: loop header
LB: loop body
LE: loop exit
PB: predicated region body
PF: predicated region fallthrough
CT: control target
= control target key end

     0   :  { %7 = vsyncpa [#allocation5], 0  ;;  %s2159_s0 = inlined_call_operand.hbm [shape: f32[2,3,16,16], index: 0, kind: input, shape index: {}]   ;;  %s2160_s1 = inlined_call_operand.hbm [shape: f32[2,3,16,16], index: 1, kind: input, shape index: {}]   ;;  %s2161_s2 = inlined_call_operand.hbm [shape: f32[2,8,128], index: 2, kind: output, shape index: {}]  }
   0x1   :  { %9 = vsyncpa [#allocation5 + $0x1], 0 }
   0x2   :  { %10 = vsyncpa [#allocation8], 0 }
   0x3   :  { %12 = vsyncpa [#allocation8 + $0x1], 0 }
   0x4   :  { %13 = vsyncpa [#allocation6], 0 }
   0x5   :  { %15 = vsyncpa [#allocation6 + $0x1], 0  ;;  %s1547_s9 = smov 0   ;;  %s1549_s10 = smov 0  }
   0x6   :  { %s1551_s11 = smov 0   ;;  %s1553_s12 = smov 0  }
   0x7 LB: > { %s1568_s13 = sadd.s32 4294967295, %s1509_s12   ;;  %s1240_s14 = sadd.s32 4294967294, %s1509_s12   ;;  %s1509_s12 = sphi %s1553_s12, %s2176_s12   ;;  %s1505_s11 = sphi %s1551_s11, %s2175_s11   ;;  %s1501_s10 = sphi %s1549_s10, %s2174_s10   ;;  %s1497_s9 = sphi %s1547_s9, %s2173_s9  }
   0x8   : > { %s1572_s15 = sadd.s32 1, %s1509_s12   ;;  %s28_s16 = sadd.s32 1, %s1505_s11 }
   0x9   : > { %s25_s17 = ssub.s32 %s1509_s12, %s1572_s15  ;;  %p35_p0 = scmp.ne.s32.totalorder %s1505_s11, %s1501_s10 }
   0xa   : > { %p26_p1 = scmp.eq.s32.totalorder %s25_s17, 0  ;;  %p36_p2 = scmp.eq.s32.totalorder %s1509_s12, 0 }
   0xb   : > { %p41_p3 = scmp.ne.s32.totalorder %s1501_s10, %s1497_s9  ;;  %p42_p4 = scmp.eq.s32.totalorder %s1568_s13, 0 }
   0xc   : > { %s1584_s18 = scalar_select %p26_p1, %s1505_s11, %s28_s16  }
   0xd   : > { %p37_p5 = por %p36_p2, %p35_p0  ;;  %p1586_p6 = por %p42_p4, %p41_p3 }
   0xe   : > { %p91_p7 = scmp.eq.s32.totalorder %s1568_s13, 1  ;;  %p97_p8 = scmp.eq.s32.totalorder %s1240_s14, 1 }
   0xf   : > { %s2164_s19 = scalar_select %p1586_p6, 1, 0 }
  0x10   : > { %p1279_p10 = scmp.lt.s32.totalorder %s1509_s12, 2  ;;  %p1593_p11 = por %p91_p7, %p35_p0 }
  0x11   : > { %p1597_p12 = por %p97_p8, %p41_p3  ;;  %s1602_s22 = sand.u32 1, %s1505_s11  }
  0x12   : > { %s2165_s20 = scalar_select %p1593_p11, 1, 0 }
  0x13   : > { %s2166_s21 = scalar_select %p1597_p12, 1, 0 }
  0x14   : > { %s1256_s23 = smul.u32 768, %s1509_s12  ;;  %p1613_p13 = pnand %p1279_p10, %p37_p5 }
  0x15   : > { %s1255_s24 = smul.u32 48, %s1602_s22  ;;  %s118_s3 = scalar_lea.sflag [#allocation5], %s1602_s22 }
  0x16   : > { %s1611_s27 = scalar_lea.hbm %s2159_s0, %s1256_s23  ;;  %p1381_p1 = pneg %p1613_p13 }
  0x17   : > { %s121_s29 = scalar_lea.vmem [#allocation4], %s1255_s24  ;;  %s1379_s4 = scalar_lea.hbm %s1611_s27, 768 }
  0x18   : > { %s128_s30 = sshll.u32 %s121_s29, 4  ;;  %p1380_p0 = scmp.ne.s32.totalorder %s1611_s27, %s1379_s4  ;;  %s1619_s30 = int_to_ptr.vmem [resolvable:$true] %s128_s30 }
  0x19   : > { %s1384_s7 = scalar_lea.hbm %s2159_s0, 1536  ;;  %p1385_p4 = scmp.lt.u32.totalorder %s1611_s27, %s2159_s0 }
  0x1a   : > { %p1382_p2 = pnand %p1381_p1, %p1380_p0  ;;  %p1386_p5 = scmp.lt.u32.totalorder %s1384_s7, %s1379_s4 }
  0x1b   : > { %p1388_p8 = scmp.lt.u32.totalorder %s1379_s4, %s1611_s27 }
  0x1c   : > { %p1383_p3 = pneg %p1382_p2  ;;  %p1387_p7 = por %p1386_p5, %p1385_p4 }
  0x1e   : > { %p1389_p10 = por %p1388_p8, %p1387_p7 }
  0x20   : > { %p1390_p9 = pnand %p1389_p10, %p1383_p3 }
  0x22   : > { %1393 = shalt.err (!%p1390_p9)
}
  0x23   : > { %s1394_s16 = scalar_lea.vmem %s1619_s30, 768  ;;  %s1511_s17 = smov [#allocation4]  }
  0x24   : > { %p1395_p0 = scmp.ne.s32.totalorder %s1619_s30, %s1394_s16  ;;  %s1399_s25 = sshll.u32 %s1511_s17, 4  ;;  %s1400_s25 = int_to_ptr.vmem [resolvable:$false] %s1399_s25 }
  0x25   : > { %s1401_s26 = scalar_lea.vmem %s1400_s25, 1536  ;;  %p1402_p11 = scmp.lt.s32.totalorder %s1619_s30, %s1400_s25 }
  0x26   : > { %p1397_p2 = pnand %p1395_p0, %p1381_p1  ;;  %p1403_p4 = scmp.lt.s32.totalorder %s1401_s26, %s1394_s16 }
  0x28   : > { %p1398_p12 = pneg %p1397_p2  ;;  %p1404_p5 = por %p1403_p4, %p1402_p11 }
  0x2a   : > { %p1405_p7 = pnand %p1404_p5, %p1398_p12 }
  0x2c   : > { %1408 = shalt.err (!%p1405_p7)
}
  0x2d   : > { %s1512_s29 = smov 128   ;;  %s1513_s4 = smov 8  }
  0x2e   : > { %1271 = dma.hbm_to_vmem [thread:$0]  (!%p1613_p13), %s1611_s27, 768, %s1619_s30, %s118_s3, %s1512_s29, %s1512_s29, %s1513_s4  }
  0x2f   : > { %p1245_p9 = scmp.ge.s32.totalorder %s1509_s12, 1  ;;  %p157_p11 = scmp.lt.s32.totalorder %s1509_s12, 3 }
  0x30   : > { %s1663_s8 = scalar_lea.hbm %s2160_s1, %s1256_s23  ;;  %s142_s14 = scalar_lea.vmem [#allocation7], %s1255_s24 }
  0x31   : > { %p1654_p12 = pnand %p1245_p9, %p157_p11  ;;  %s149_s16 = sshll.u32 %s142_s14, 4  ;;  %s1667_s16 = int_to_ptr.vmem [resolvable:$true] %s149_s16 }
  0x32   : > { %s139_s27 = scalar_lea.sflag [#allocation8], %s1602_s22  ;;  %s1409_s30 = scalar_lea.hbm %s1663_s8, 768 }
  0x33   : > { %p1410_p3 = scmp.ne.s32.totalorder %s1663_s8, %s1409_s30  ;;  %s1414_s23 = scalar_lea.hbm %s2160_s1, 1536 }
  0x34   : > { %p1415_p0 = scmp.lt.u32.totalorder %s1663_s8, %s2160_s1  ;;  %p1416_p2 = scmp.lt.u32.totalorder %s1414_s23, %s1409_s30 }
  0x35   : > { %p1412_p8 = pnand %p1410_p3, %p1381_p1  ;;  %p1418_p5 = scmp.lt.u32.totalorder %s1409_s30, %s1663_s8 }
  0x36   : > { %p1417_p4 = por %p1416_p2, %p1415_p0 }
  0x37   : > { %p1413_p10 = pneg %p1412_p8 }
  0x38   : > { %p1419_p7 = por %p1418_p5, %p1417_p4 }
  0x3a   : > { %p1420_p9 = pnand %p1419_p7, %p1413_p10 }
  0x3c   : > { %1423 = shalt.err (!%p1420_p9)
}
  0x3d   : > { %s1424_s24 = scalar_lea.vmem %s1667_s16, 768  ;;  %s1514_s6 = smov [#allocation7]  }
  0x3e   : > { %p1425_p11 = scmp.ne.s32.totalorder %s1667_s16, %s1424_s24  ;;  %s1429_s7 = sshll.u32 %s1514_s6, 4  ;;  %s1430_s7 = int_to_ptr.vmem [resolvable:$false] %s1429_s7 }
  0x3f   : > { %s1431_s14 = scalar_lea.vmem %s1430_s7, 1536  ;;  %p1432_p6 = scmp.lt.s32.totalorder %s1667_s16, %s1430_s7 }
  0x40   : > { %p1427_p3 = pnand %p1425_p11, %p1381_p1  ;;  %p1433_p0 = scmp.lt.s32.totalorder %s1431_s14, %s1424_s24 }
  0x42   : > { %p1428_p8 = pneg %p1427_p3  ;;  %p1434_p2 = por %p1433_p0, %p1432_p6 }
  0x44   : > { %p1435_p4 = pnand %p1434_p2, %p1428_p8 }
  0x46   : > { %1438 = shalt.err (!%p1435_p4)
}
  0x47   : > { %1274 = dma.hbm_to_vmem [thread:$0]  (!%p1613_p13), %s1663_s8, 768, %s1667_s16, %s139_s27, %s1512_s29, %s1512_s29, %s1513_s4  }
  0x48   : > { %161 = sbr.rel (%p1654_p12) target bundleno = 840 (0x348), region = 28  ;;  %s1701_s30 = sand.u32 (!%p1654_p12), 1, %s1501_s10  }
  0x49   : > { %s1259_s3 = smul.u32 (!%p1654_p12), 48, %s1701_s30  ;;  %s164_s17 = scalar_lea.sflag (!%p1654_p12), [#allocation5], %s1701_s30 }
  0x4a   : > { %p2169_p6 = scmp.ne.s32.totalorder (!%p1654_p12), %s2164_s19, 0 }
  0x4b   : > { %s167_s28 = scalar_lea.vmem (!%p1654_p12), [#allocation4], %s1259_s3 }
  0x4f   : > { %1484 = dma.done.wait (%p2169_p6), %s164_s17, 768  }
  0x50   : > { %1486 = vsyncadd (%p2169_p6), %s164_s17, 4294966528  ;;  %s173_s22 = scalar_lea.sflag [#allocation8], %s1701_s30  ;;  %s1710_s29 = scalar_lea.vmem [#allocation7], %s1259_s3 }
  0x51   : > { %1488 = dma.done.wait (%p2169_p6), %s173_s22, 768  }
  0x52   : > { %1490 = vsyncadd (%p2169_p6), %s173_s22, 4294966528  ;;  %vm560_vm0 = vcmask 130048   ;;  %vm564_vm1 = vcmask 128000   ;;  %v1515_v0 = vmov 0.0   ;;  %v202_v1 = vld [vmem:[%s167_s28] sm:$0xff]  ;;  %v203_v2 = vld [vmem:[%s167_s28 + $0x8] sm:$0xff] }
  0x53   : > { %561 = vst.msk [vmem:[#allocation2] sm:$0xff] %vm560_vm0, %v1515_v0  ;;  %562 = vst.msk [vmem:[#allocation2 + $0x8] sm:$0xff] %vm560_vm0, %v1515_v0  ;;  %v204_v3 = vld [vmem:[%s167_s28 + $0x10] sm:$0xff]  ;;  %v205_v4 = vld [vmem:[%s167_s28 + $0x18] sm:$0xff]  ;;  %v214_v7 = vmul.f32 255.0, %v202_v1  ;;  %v215_v8 = vmul.f32 255.0, %v203_v2 }
  0x54   : > { %563 = vst.msk [vmem:[#allocation2 + $0x10] sm:$0xff] %vm560_vm0, %v1515_v0  ;;  %v206_v5 = vld [vmem:[%s167_s28 + $0x20] sm:$0xff]  ;;  %v207_v6 = vld [vmem:[%s167_s28 + $0x28] sm:$0xff]  ;;  %v216_v9 = vmul.f32 255.0, %v204_v3  ;;  %v217_v10 = vmul.f32 255.0, %v205_v4  ;;  %v210_v43 = vld [vmem:[%s1710_s29 + $0x10] sm:$0xff] }
  0x55   : > { %565 = vst.msk [vmem:[#allocation2 + $0x18] sm:$0x3f] %vm564_vm1, %v1515_v0  ;;  %v218_v11 = vmul.f32 255.0, %v206_v5  ;;  %v219_v12 = vmul.f32 255.0, %v207_v6  ;;  %v220_v13 = vfloor.f32 %v214_v7  ;;  %v221_v14 = vfloor.f32 %v215_v8  ;;  %v208_v38 = vld [vmem:[%s1710_s29] sm:$0xff]  ;;  %v209_v39 = vld [vmem:[%s1710_s29 + $0x8] sm:$0xff] }
  0x56   : > { %v222_v15 = vfloor.f32 %v216_v9  ;;  %v223_v16 = vfloor.f32 %v217_v10  ;;  %v211_v46 = vld [vmem:[%s1710_s29 + $0x18] sm:$0xff]  ;;  %v212_v49 = vld [vmem:[%s1710_s29 + $0x20] sm:$0xff]  ;;  %v213_v50 = vld [vmem:[%s1710_s29 + $0x28] sm:$0xff]  ;;  %v384_v51 = vmul.f32 255.0, %v208_v38  ;;  %v385_v52 = vmul.f32 255.0, %v209_v39  ;;  %s1516_s19 = smov 7  }
  0x57   : > { %v224_v17 = vfloor.f32 %v218_v11  ;;  %v225_v18 = vfloor.f32 %v219_v12  ;;  %v226_v19 = vmax.f32 %v220_v13, 0.0  ;;  %v227_v20 = vmax.f32 %v221_v14, 0.0  ;;  %s1517_s4 = smov 127   ;;  %s1518_s5 = smov 126  }
  0x58   : > { %v228_v21 = vmax.f32 %v222_v15, 0.0  ;;  %v229_v22 = vmax.f32 %v223_v16, 0.0  ;;  %v386_v54 = vmul.f32 255.0, %v210_v43  ;;  %v387_v58 = vmul.f32 255.0, %v211_v46  ;;  %s1519_s8 = smov 125   ;;  %s1520_s16 = smov 124  }
  0x59   : > { %v230_v23 = vmax.f32 %v224_v17, 0.0  ;;  %v231_v24 = vmax.f32 %v225_v18, 0.0  ;;  %v232_v25 = vmin.f32 %v226_v19, 255.0  ;;  %v233_v26 = vmin.f32 %v227_v20, 255.0  ;;  %s1521_s27 = smov 123   ;;  %s1522_s23 = smov 122  }
  0x5a   : > { %v234_v27 = vmin.f32 %v228_v21, 255.0  ;;  %v235_v28 = vmin.f32 %v229_v22, 255.0  ;;  %v388_v59 = vmul.f32 255.0, %v212_v49  ;;  %v389_v60 = vmul.f32 255.0, %v213_v50  ;;  %s1523_s25 = smov 121   ;;  %s1524_s26 = smov 120  }
  0x5b   : > { %v236_v29 = vmin.f32 %v230_v23, 255.0  ;;  %v237_v30 = vmin.f32 %v231_v24, 255.0  ;;  %v1723_v31 = vmul.f32 0.003921569, %v232_v25  ;;  %v239_v32 = vmul.f32 0.003921569, %v233_v26 }
  0x5c   : > { %v1725_v33 = vmul.f32 0.003921569, %v234_v27  ;;  %v241_v34 = vmul.f32 0.003921569, %v235_v28  ;;  %v390_v61 = vfloor.f32 %v384_v51  ;;  %v391_v62 = vfloor.f32 %v385_v52  ;;  %s1525_s24 = smov 119   ;;  %s1526_s6 = smov 118  }
  0x5d   : > { %v1727_v35 = vmul.f32 0.003921569, %v236_v29  ;;  %v1729_v36 = vmul.f32 0.003921569, %v237_v30  ;;  %v254_v37 = vmul.f32 0.212671, %v1723_v31  ;;  %v392_v1 = vfloor.f32 %v386_v54 }
  0x5e   : > { %v255_v40 = vmul.f32 0.212671, %v239_v32  ;;  %v256_v41 = vmul.f32 0.71516, %v1725_v33  ;;  %v257_v42 = vmul.f32 0.71516, %v241_v34  ;;  %v393_v5 = vfloor.f32 %v387_v58 }
  0x5f   : > { %v260_v44 = vmul.f32 0.072169, %v1727_v35  ;;  %v261_v45 = vmul.f32 0.072169, %v1729_v36  ;;  %v245_v55 = vmul.f32 0.412453, %v239_v32  ;;  %v394_v8 = vfloor.f32 %v388_v59 }
  0x60   : > { %v258_v47 = vadd.f32 %v256_v41, %v254_v37  ;;  %v259_v48 = vadd.f32 %v257_v42, %v255_v40  ;;  %v247_v56 = vmul.f32 0.35758, %v241_v34  ;;  %v251_v3 = vmul.f32 0.180423, %v1729_v36  ;;  %s1527_s7 = smov 117   ;;  %s1528_s14 = smov 116  }
  0x61   : > { %v264_v6 = vmul.f32 0.019334, %v1723_v31  ;;  %v266_v7 = vmul.f32 0.119193, %v1725_v33  ;;  %v395_v9 = vfloor.f32 %v389_v60  ;;  %v396_v10 = vmax.f32 %v390_v61, 0.0  ;;  %s1529_s3 = smov 115  }
  0x62   : > { %v1741_v53 = vadd.f32 %v260_v44, %v258_v47  ;;  %v1743_v57 = vadd.f32 %v261_v45, %v259_v48  ;;  %v249_v2 = vadd.f32 %v247_v56, %v245_v55  ;;  %v397_v11 = vmax.f32 %v391_v62, 0.0  ;;  %s1530_s17 = smov 114   ;;  %s1246_s28 = sshll.u32 %s1701_s30, 3 }
  0x63   : > { %v398_v13 = vmax.f32 %v392_v1, 0.0  ;;  %v399_v14 = vmax.f32 %v393_v5, 0.0  ;;  %v268_v15 = vadd.f32 %v266_v7, %v264_v6  ;;  %v270_v16 = vmul.f32 0.950227, %v1727_v35  ;;  %s201_s22 = scalar_lea.vmem [#allocation9], %s1246_s28  ;;  %p2170_p1 = scmp.ne.s32.totalorder %s2165_s20, 0 }
  0x64   : > { %v298_v63 = vmax.f32 %v1741_v53, 1e-30  ;;  %v299_v4 = vmax.f32 %v1743_v57, 1e-30  ;;  %v253_v12 = vadd.f32 %v251_v3, %v249_v2  ;;  %v400_v17 = vmax.f32 %v394_v8, 0.0  ;;  %s1147_s29 = sshll.u32 %s201_s22, 4  ;;  %s2112_s29 = int_to_ptr.vmem [resolvable:$true] %s1147_s29 }
  0x65   : > { %v401_v18 = vmax.f32 %v395_v9, 0.0  ;;  %v402_v19 = vmin.f32 %v396_v10, 255.0  ;;  %v403_v20 = vmin.f32 %v397_v11, 255.0  ;;  %v404_v21 = vmin.f32 %v398_v13, 255.0 }
  0x66   : > { %1331 = vlog2.f32 %v298_v63  ;;  %v405_v22 = vmin.f32 %v399_v14, 255.0  ;;  %v265_v23 = vmul.f32 0.019334, %v239_v32  ;;  %v267_v24 = vmul.f32 0.119193, %v241_v34 }
  0x67   : > { %1333 = vlog2.f32 %v299_v4  ;;  %v1751_v25 = vmul.f32 1.0521265, %v253_v12  ;;  %v406_v26 = vmin.f32 %v400_v17, 255.0  ;;  %v407_v27 = vmin.f32 %v401_v18, 255.0 }
  0x68   : > { %v408_v28 = vmul.f32 0.003921569, %v402_v19  ;;  %v409_v29 = vmul.f32 0.003921569, %v403_v20  ;;  %v410_v30 = vmul.f32 0.003921569, %v404_v21  ;;  %v272_v38 = vadd.f32 %v270_v16, %v268_v15 }
  0x69   : > { %v411_v37 = vmul.f32 0.003921569, %v405_v22  ;;  %v279_v43 = vmax.f32 %v1751_v25, 1e-30  ;;  %v412_v44 = vmul.f32 0.003921569, %v406_v26  ;;  %v269_v46 = vadd.f32 %v267_v24, %v265_v23 }
  0x6a   : > { %v414_v39 = vmul.f32 0.412453, %v408_v28  ;;  %v415_v40 = vmul.f32 0.412453, %v409_v29  ;;  %v416_v41 = vmul.f32 0.35758, %v410_v30 }
  0x6b   : > { %v417_v42 = vmul.f32 0.35758, %v411_v37  ;;  %v271_v32 = vmul.f32 0.950227, %v1729_v36  ;;  %v413_v34 = vmul.f32 0.003921569, %v407_v27  ;;  %1335 = vlog2.f32 %v279_v43 }
  0x6c   : > { %v1755_v48 = vmul.f32 0.9184811, %v272_v38  ;;  %v418_v49 = vadd.f32 %v416_v41, %v414_v39  ;;  %v420_v50 = vmul.f32 0.180423, %v412_v44  ;;  %v424_v55 = vmul.f32 0.212671, %v408_v28 }
  0x6d   : > { %v419_v51 = vadd.f32 %v417_v42, %v415_v40  ;;  %v421_v52 = vmul.f32 0.180423, %v413_v34  ;;  %v273_v56 = vadd.f32 %v271_v32, %v269_v46  ;;  %v425_v59 = vmul.f32 0.212671, %v409_v29 }
  0x6e   : > { %v426_v60 = vmul.f32 0.71516, %v410_v30  ;;  %v318_v61 = vmax.f32 %v1755_v48, 1e-30  ;;  %v422_v62 = vadd.f32 %v420_v50, %v418_v49  ;;  %v427_v63 = vmul.f32 0.71516, %v411_v37 }
  0x6f   : > { %v430_v36 = vmul.f32 0.072169, %v412_v44  ;;  %v423_v1 = vadd.f32 %v421_v52, %v419_v51  ;;  %v431_v3 = vmul.f32 0.072169, %v413_v34  ;;  %v434_v4 = vmul.f32 0.019334, %v408_v28 }
  0x70   : > { %v1332_v45 = vpop.eup %1331  ;;  %v428_v2 = vadd.f32 %v426_v60, %v424_v55  ;;  %v429_v6 = vadd.f32 %v427_v63, %v425_v59  ;;  %v435_v7 = vmul.f32 0.019334, %v409_v29  ;;  %v436_v8 = vmul.f32 0.119193, %v410_v30 }
  0x71   : > { %v1334_v47 = vpop.eup %1333  ;;  %v301_v54 = vmul.f32 0.6931472, %v1332_v45  ;;  %v437_v10 = vmul.f32 0.119193, %v411_v37  ;;  %v440_v11 = vmul.f32 0.950227, %v412_v44  ;;  %1337 = vlog2.f32 %v318_v61 }
  0x72   : > { %v303_v58 = vmul.f32 0.6931472, %v1334_v47  ;;  %v1758_v12 = vadd.f32 %v430_v36, %v428_v2  ;;  %v438_v13 = vadd.f32 %v436_v8, %v434_v4  ;;  %v441_v14 = vmul.f32 0.950227, %v413_v34 }
  0x73   : > { %v304_v5 = vmul.f32 0.33333334, %v301_v54  ;;  %v1760_v15 = vmul.f32 1.0521265, %v422_v62  ;;  %v1762_v16 = vadd.f32 %v431_v3, %v429_v6  ;;  %v439_v17 = vadd.f32 %v437_v10, %v435_v7 }
  0x74   : > { %v305_v9 = vmul.f32 0.33333334, %v303_v58  ;;  %v1764_v18 = vmul.f32 1.0521265, %v423_v1  ;;  %v1766_v19 = vmul.f32 0.9184811, %v273_v56  ;;  %v442_v23 = vadd.f32 %v440_v11, %v438_v13 }
  0x75   : > { %v306_v20 = vmul.f32 1.442695, %v304_v5  ;;  %v448_v21 = vmax.f32 %v1760_v15, 1e-30  ;;  %v1336_v26 = vpop.eup %1335  ;;  %v443_v27 = vadd.f32 %v441_v14, %v439_v17  ;;  %v468_v28 = vmax.f32 %v1758_v12, 1e-30 }
  0x76   : > { %v308_v22 = vmul.f32 1.442695, %v305_v9  ;;  %v449_v24 = vmax.f32 %v1764_v18, 1e-30  ;;  %v469_v29 = vmax.f32 %v1762_v16, 1e-30 }
  0x77   : > { %1339 = vlog2.f32 %v448_v21  ;;  %v283_v30 = vmul.f32 0.6931472, %v1336_v26  ;;  %v319_v37 = vmax.f32 %v1766_v19, 1e-30  ;;  %v1773_v38 = vmul.f32 0.9184811, %v442_v23 }
  0x78   : > { %1341 = vlog2.f32 %v449_v24  ;;  %v1775_v39 = vmul.f32 0.9184811, %v443_v27  ;;  %v312_v42 = vmul.f32 7.787, %v1741_v53  ;;  %v313_v43 = vmul.f32 7.787, %v1743_v57 }
  0x79   : > { %1343 = vpow2.f32 %v306_v20  ;;  %v285_v40 = vmul.f32 0.33333334, %v283_v30  ;;  %v488_v41 = vmax.f32 %v1773_v38, 1e-30  ;;  %vm566_vm2 = vcmask 244736  }
  0x7a   : > { %1345 = vpow2.f32 %v308_v22  ;;  %v489_v44 = vmax.f32 %v1775_v39, 1e-30  ;;  %v246_v34 = vmul.f32 0.35758, %v1725_v33  ;;  %v244_v49 = vmul.f32 0.412453, %v1723_v31 }
  0x7b   : > { %1347 = vlog2.f32 %v468_v28  ;;  %v1338_v45 = vpop.eup %1337  ;;  %v288_v47 = vmul.f32 1.442695, %v285_v40  ;;  %567 = vst.msk [vmem:[#allocation3] sm:$0xff] %vm566_vm2, %v1515_v0  ;;  %568 = vst.msk [vmem:[#allocation3 + $0x8] sm:$0xff] %vm566_vm2, %v1515_v0  ;;  %v314_v51 = vadd.f32 0.13793103, %v312_v42 }
  0x7c   : > { %1349 = vlog2.f32 %v469_v29  ;;  %v315_v52 = vadd.f32 0.13793103, %v313_v43  ;;  %vm310_vm3 = vcmp.gt.f32.partialorder %v1741_v53, 0.008856  ;;  %vm311_vm4 = vcmp.gt.f32.partialorder %v1743_v57, 0.008856 }
  0x7d   : > { %1351 = vlog2.f32 %v319_v37  ;;  %v250_v31 = vmul.f32 0.180423, %v1727_v35  ;;  %v248_v60 = vadd.f32 %v246_v34, %v244_v49  ;;  %vm291_vm5 = vcmp.gt.f32.partialorder %v1751_v25, 0.008856 }
  0x7e   : > { %1353 = vlog2.f32 %v488_v41  ;;  %v321_v1 = vmul.f32 0.6931472, %v1338_v45  ;;  %v293_v7 = vmul.f32 7.787, %v1751_v25  ;;  %v342_v11 = vmul.f32 903.3, %v1741_v53 }
  0x7f   : > { %1355 = vlog2.f32 %v489_v44  ;;  %v252_v6 = vadd.f32 %v250_v31, %v248_v60  ;;  %v343_v13 = vmul.f32 903.3, %v1743_v57  ;;  %v463_v37 = vmul.f32 7.787, %v1764_v18 }
  0x80   : > { %1357 = vpow2.f32 %v288_v47  ;;  %v324_v20 = vmul.f32 0.33333334, %v321_v1  ;;  %v295_v27 = vadd.f32 0.13793103, %v293_v7  ;;  %v482_v43 = vmul.f32 7.787, %v1758_v12 }
  0x81   : > { %v1340_v46 = vpop.eup %1339  ;;  %v1802_v26 = vmul.f32 1.0521265, %v252_v6  ;;  %v462_v47 = vmul.f32 7.787, %v1760_v15  ;;  %vm461_vm6 = vcmp.gt.f32.partialorder %v1764_v18, 0.008856 }
  0x82   : > { %v1342_v32 = vpop.eup %1341  ;;  %v451_v33 = vmul.f32 0.6931472, %v1340_v46  ;;  %v326_v42 = vmul.f32 1.442695, %v324_v20  ;;  %v483_v46 = vmul.f32 7.787, %v1762_v16 }
  0x83   : > { %v1344_v50 = vpop.eup %1343  ;;  %v453_v54 = vmul.f32 0.6931472, %v1342_v32  ;;  %v278_v41 = vmax.f32 %v1802_v26, 1e-30  ;;  %vm480_vm7 = vcmp.gt.f32.partialorder %v1758_v12, 0.008856 }
  0x84   : > { %v1346_v55 = vpop.eup %1345  ;;  %v1790_v0 = vsel %vm310_vm3, %v1344_v50, %v314_v51  ;;  %v454_v2 = vmul.f32 0.33333334, %v451_v33  ;;  %v465_v50 = vadd.f32 0.13793103, %v463_v37  ;;  %vm481_vm8 = vcmp.gt.f32.partialorder %v1762_v16, 0.008856 }
  0x85   : > { %v1348_v56 = vpop.eup %1347  ;;  %v455_v58 = vmul.f32 0.33333334, %v453_v54  ;;  %v1794_v61 = vsel %vm311_vm4, %v1346_v55, %v315_v52  ;;  %v338_v35 = vmul.f32 116.0, %v1790_v0  ;;  %v484_v55 = vadd.f32 0.13793103, %v482_v43 }
  0x86   : > { %v1350_v59 = vpop.eup %1349  ;;  %v471_v36 = vmul.f32 0.6931472, %v1348_v56  ;;  %v339_v4 = vmul.f32 116.0, %v1794_v61  ;;  %v456_v21 = vmul.f32 1.442695, %v454_v2  ;;  %vm630_vm15 = vcmask 187448  }
  0x87   : > { %v458_v62 = vmul.f32 1.442695, %v455_v58  ;;  %v1352_v63 = vpop.eup %1351  ;;  %v473_v3 = vmul.f32 0.6931472, %v1350_v59  ;;  %v1247_v23 = vadd.f32 -16.0, %v338_v35 }
  0x88   : > { %v474_v5 = vmul.f32 0.33333334, %v471_v36  ;;  %v323_v8 = vmul.f32 0.6931472, %v1352_v63  ;;  %v1354_v10 = vpop.eup %1353  ;;  %v1248_v24 = vadd.f32 -16.0, %v339_v4 }
  0x89   : > { %1359 = vpow2.f32 %v458_v62  ;;  %v475_v9 = vmul.f32 0.33333334, %v473_v3  ;;  %v1356_v17 = vpop.eup %1355  ;;  %v491_v29 = vmul.f32 0.6931472, %v1354_v10  ;;  %v344_v44 = vsel %vm310_vm3, %v1247_v23, %v342_v11 }
  0x8a   : > { %v476_v14 = vmul.f32 1.442695, %v474_v5  ;;  %v325_v28 = vmul.f32 0.33333334, %v323_v8  ;;  %v1358_v30 = vpop.eup %1357  ;;  %v493_v40 = vmul.f32 0.6931472, %v1356_v17  ;;  %v345_v45 = vsel %vm311_vm4, %v1248_v24, %v343_v13 }
  0x8b   : > { %v478_v22 = vmul.f32 1.442695, %v475_v9  ;;  %v297_v32 = vsel %vm291_vm5, %v1358_v30, %v295_v27  ;;  %v494_v49 = vmul.f32 0.33333334, %v491_v29  ;;  %v358_v53 = vmul.f32 2.55, %v344_v44 }
  0x8c   : > { %1361 = vpow2.f32 %v476_v14  ;;  %v328_v34 = vmul.f32 1.442695, %v325_v28  ;;  %v495_v51 = vmul.f32 0.33333334, %v493_v40  ;;  %v359_v54 = vmul.f32 2.55, %v345_v45 }
  0x8d   : > { %1363 = vpow2.f32 %v478_v22  ;;  %v347_v57 = vsub.f32 %v297_v32, %v1794_v61  ;;  %v485_v56 = vadd.f32 0.13793103, %v483_v46  ;;  %v496_v25 = vmul.f32 1.442695, %v494_v49 }
  0x8e   : > { %1365 = vpow2.f32 %v456_v21  ;;  %v498_v59 = vmul.f32 1.442695, %v495_v51  ;;  %v360_v31 = vadd.f32 0.5, %v358_v53  ;;  %v361_v60 = vadd.f32 0.5, %v359_v54 }
  0x8f   : > { %1367 = vlog2.f32 %v278_v41  ;;  %v464_v62 = vadd.f32 0.13793103, %v462_v47  ;;  %v349_v36 = vmul.f32 500.0, %v347_v57  ;;  %v512_v3 = vmul.f32 903.3, %v1758_v12 }
  0x90   : > { %1369 = vpow2.f32 %v326_v42  ;;  %v513_v5 = vmul.f32 903.3, %v1762_v16  ;;  %vm460_vm9 = vcmp.gt.f32.partialorder %v1760_v15, 0.008856  ;;  %vm330_vm10 = vcmp.gt.f32.partialorder %v1755_v48, 0.008856 }
  0x91   : > { %1371 = vpow2.f32 %v328_v34  ;;  %vm331_vm11 = vcmp.gt.f32.partialorder %v1766_v19, 0.008856  ;;  %v362_v9 = vfloor.f32 %v360_v31  ;;  %v363_v10 = vfloor.f32 %v361_v60 }
  0x92   : > { %1373 = vpow2.f32 %v496_v25  ;;  %v332_v14 = vmul.f32 7.787, %v1755_v48  ;;  %v333_v17 = vmul.f32 7.787, %v1766_v19  ;;  %v351_v22 = vadd.f32 128.0, %v349_v36 }
  0x93   : > { %v1360_v52 = vpop.eup %1359  ;;  %1375 = vpow2.f32 %v498_v59  ;;  %v502_v27 = vmul.f32 7.787, %v1773_v38  ;;  %v364_v37 = vmax.f32 %v362_v9, 0.0  ;;  %v365_v40 = vmax.f32 %v363_v10, 0.0 }
  0x94   : > { %v467_v58 = vsel %vm461_vm6, %v1360_v52, %v465_v50  ;;  %v503_v41 = vmul.f32 7.787, %v1775_v39  ;;  %v334_v32 = vadd.f32 0.13793103, %v332_v14  ;;  %v335_v16 = vadd.f32 0.13793103, %v333_v17 }
  0x95   : > { %vm500_vm12 = vcmp.gt.f32.partialorder %v1773_v38, 0.008856  ;;  %v369_v47 = vadd.f32 0.5, %v351_v22  ;;  %vm501_vm13 = vcmp.gt.f32.partialorder %v1775_v39, 0.008856  ;;  %v366_v51 = vmin.f32 %v364_v37, 255.0 }
  0x96   : > { %v1362_v33 = vpop.eup %1361  ;;  %v504_v52 = vadd.f32 0.13793103, %v502_v27  ;;  %v505_v53 = vadd.f32 0.13793103, %v503_v41  ;;  %v367_v57 = vmin.f32 %v365_v40, 255.0 }
  0x97   : > { %v1364_v18 = vpop.eup %1363  ;;  %v1821_v63 = vsel %vm480_vm7, %v1362_v33, %v484_v55  ;;  %v292_v59 = vmul.f32 7.787, %v1802_v26  ;;  %vm290_vm14 = vcmp.gt.f32.partialorder %v1802_v26, 0.008856 }
  0x98   : > { %v1825_v1 = vsel %vm481_vm8, %v1364_v18, %v485_v56  ;;  %v508_v2 = vmul.f32 116.0, %v1821_v63  ;;  %v1366_v35 = vpop.eup %1365 }
  0x99   : > { %v509_v4 = vmul.f32 116.0, %v1825_v1  ;;  %v517_v6 = vsub.f32 %v467_v58, %v1825_v1  ;;  %v1368_v7 = vpop.eup %1367  ;;  %v466_v15 = vsel %vm460_vm9, %v1366_v35, %v464_v62  ;;  %v294_v19 = vadd.f32 0.13793103, %v292_v59 }
  0x9a   : > { %v1249_v8 = vadd.f32 -16.0, %v508_v2  ;;  %v281_v13 = vmul.f32 0.6931472, %v1368_v7  ;;  %v1370_v30 = vpop.eup %1369  ;;  %v516_v12 = vsub.f32 %v466_v15, %v1821_v63 }
  0x9b   : > { %v1250_v11 = vadd.f32 -16.0, %v509_v4  ;;  %v519_v21 = vmul.f32 500.0, %v517_v6  ;;  %v1372_v43 = vpop.eup %1371  ;;  %v336_v18 = vsel %vm330_vm10, %v1370_v30, %v334_v32 }
  0x9c   : > { %v514_v20 = vsel %vm480_vm7, %v1249_v8, %v512_v3  ;;  %v284_v29 = vmul.f32 0.33333334, %v281_v13  ;;  %v1374_v50 = vpop.eup %1373  ;;  %v518_v56 = vmul.f32 500.0, %v516_v12  ;;  %v337_v31 = vsel %vm331_vm11, %v1372_v43, %v335_v16 }
  0x9d   : > { %v515_v23 = vsel %vm481_vm8, %v1250_v11, %v513_v5  ;;  %v528_v24 = vmul.f32 2.55, %v514_v20  ;;  %v521_v44 = vadd.f32 128.0, %v519_v21  ;;  %v1376_v55 = vpop.eup %1375  ;;  %v506_v62 = vsel %vm500_vm12, %v1374_v50, %v504_v52 }
  0x9e   : > { %v529_v28 = vmul.f32 2.55, %v515_v23  ;;  %v286_v46 = vmul.f32 1.442695, %v284_v29  ;;  %v507_v36 = vsel %vm501_vm13, %v1376_v55, %v505_v53  ;;  %v371_v3 = vfloor.f32 %v369_v47 }
  0x9f   : > { %v530_v42 = vadd.f32 0.5, %v528_v24  ;;  %v539_v33 = vadd.f32 0.5, %v521_v44  ;;  %v520_v35 = vadd.f32 128.0, %v518_v56  ;;  %v352_v6 = vsub.f32 %v1790_v0, %v336_v18 }
  0xa0   : > { %v531_v45 = vadd.f32 0.5, %v529_v28  ;;  %1377 = vpow2.f32 %v286_v46  ;;  %v353_v48 = vsub.f32 %v1794_v61, %v337_v31  ;;  %v522_v7 = vsub.f32 %v1821_v63, %v506_v62 }
  0xa1   : > { %v532_v34 = vfloor.f32 %v530_v42  ;;  %v541_v4 = vfloor.f32 %v539_v33  ;;  %v523_v38 = vsub.f32 %v1825_v1, %v507_v36  ;;  %v373_v8 = vmax.f32 %v371_v3, 0.0 }
  0xa2   : > { %v533_v49 = vfloor.f32 %v531_v45  ;;  %v538_v9 = vadd.f32 0.5, %v520_v35  ;;  %v354_v11 = vmul.f32 200.0, %v352_v6  ;;  %v355_v13 = vmul.f32 200.0, %v353_v48 }
  0xa3   : > { %v534_v54 = vmax.f32 %v532_v34, 0.0  ;;  %v543_v10 = vmax.f32 %v541_v4, 0.0  ;;  %v524_v17 = vmul.f32 200.0, %v522_v7  ;;  %v525_v61 = vmul.f32 200.0, %v523_v38 }
  0xa4   : > { %v535_v25 = vmax.f32 %v533_v49, 0.0  ;;  %v375_v21 = vmin.f32 %v373_v8, 255.0  ;;  %v540_v22 = vfloor.f32 %v538_v9  ;;  %v356_v27 = vadd.f32 128.0, %v354_v11 }
  0xa5   : > { %v536_v58 = vmin.f32 %v534_v54, 255.0  ;;  %v545_v63 = vmin.f32 %v543_v10, 255.0  ;;  %v357_v26 = vadd.f32 128.0, %v355_v13  ;;  %v526_v40 = vadd.f32 128.0, %v524_v17 }
  0xa6   : > { %v537_v60 = vmin.f32 %v535_v25, 255.0  ;;  %v527_v41 = vadd.f32 128.0, %v525_v61  ;;  %v542_v45 = vmax.f32 %v540_v22, 0.0  ;;  %v376_v50 = vadd.f32 0.5, %v356_v27 }
  0xa7   : > { %v554_v2 = vsub.f32 %v366_v51, %v536_v58  ;;  %v557_v46 = vsub.f32 %v375_v21, %v545_v63  ;;  %v377_v51 = vadd.f32 0.5, %v357_v26  ;;  %v546_v56 = vadd.f32 0.5, %v526_v40 }
  0xa8   : > { %v555_v5 = vsub.f32 %v367_v57, %v537_v60  ;;  %v547_v25 = vadd.f32 0.5, %v527_v41  ;;  %v544_v3 = vmin.f32 %v542_v45, 255.0  ;;  %v378_v6 = vfloor.f32 %v376_v50 }
  0xa9   : > { %569 = vst.msk [vmem:[#allocation2 + $0x7] sm:$0xff] %vm560_vm0, %v554_v2  ;;  %v379_v48 = vfloor.f32 %v377_v51  ;;  %v548_v7 = vfloor.f32 %v546_v56 }
  0xaa   : > { %570 = vst.msk [vmem:[#allocation2 + $0xf] sm:$0xff] %vm560_vm0, %v555_v5  ;;  %v1378_v39 = vpop.eup %1377  ;;  %v549_v38 = vfloor.f32 %v547_v25 }
  0xab   : > { %v296_v14 = vsel %vm290_vm14, %v1378_v39, %v294_v19  ;;  %v381_v61 = vmax.f32 %v379_v48, 0.0 }
  0xac   : > { %v346_v20 = vsub.f32 %v296_v14, %v1790_v0  ;;  %v380_v14 = vmax.f32 %v378_v6, 0.0  ;;  %v551_v21 = vmax.f32 %v549_v38, 0.0 }
  0xae   : > { %v348_v24 = vmul.f32 500.0, %v346_v20  ;;  %v550_v20 = vmax.f32 %v548_v7, 0.0  ;;  %v553_v26 = vmin.f32 %v551_v21, 255.0 }
  0xb0   : > { %v571_v15 = vld [vmem:[#allocation2] sm:$0xff]  ;;  %v350_v12 = vadd.f32 128.0, %v348_v24  ;;  %v383_v24 = vmin.f32 %v381_v61, 255.0  ;;  %v552_v27 = vmin.f32 %v550_v20, 255.0 }
  0xb1   : > { %v573_v1 = vld [vmem:[#allocation2 + $0x1] sm:$0xff]  ;;  %v574_v29 = vld [vmem:[#allocation2 + $0x9] sm:$0xff]  ;;  %v604_v59 = vld [vmem:[#allocation2 + $0x11] sm:$0xff] }
  0xb2   : > { %v577_v23 = vld [vmem:[#allocation2 + $0x2] sm:$0xff]  ;;  %v575_v30 = vadd.f32 %v573_v1, %v571_v15  ;;  %v1863_v37 = vld [vmem:[#allocation2 + $0xa] sm:$0xff]  ;;  %v368_v49 = vadd.f32 0.5, %v350_v12  ;;  %v607_v18 = vld [vmem:[#allocation2 + $0x12] sm:$0xff]  ;;  %v382_v1 = vmin.f32 %v380_v14, 255.0 }
  0xb3   : > { %v572_v28 = vld [vmem:[#allocation2 + $0x8] sm:$0xff]  ;;  %v601_v57 = vld [vmem:[#allocation2 + $0x10] sm:$0xff] }
  0xb4   : > { %v576_v42 = vadd.f32 %v574_v29, %v572_v28  ;;  %v581_v43 = vld [vmem:[#allocation2 + $0x3] sm:$0xff]  ;;  %v579_v0 = vadd.f32 %v577_v23, %v575_v30  ;;  %v582_v44 = vld [vmem:[#allocation2 + $0xb] sm:$0xff]  ;;  %v370_v58 = vfloor.f32 %v368_v49  ;;  %v610_v31 = vld [vmem:[#allocation2 + $0x13] sm:$0xff]  ;;  %v558_v45 = vsub.f32 %v382_v1, %v552_v27 }
  0xb5   : > { %v585_v16 = vld [vmem:[#allocation2 + $0x4] sm:$0xff]  ;;  %v1866_v34 = vld [vmem:[#allocation2 + $0xc] sm:$0xff]  ;;  %v613_v62 = vld [vmem:[#allocation2 + $0x14] sm:$0xff] }
  0xb6   : > { %v580_v32 = vadd.f32 %v1863_v37, %v576_v42  ;;  %v589_v47 = vld [vmem:[#allocation2 + $0x5] sm:$0xff]  ;;  %v583_v52 = vadd.f32 %v581_v43, %v579_v0  ;;  %v1868_v53 = vld [vmem:[#allocation2 + $0xd] sm:$0xff]  ;;  %v1872_v36 = vld [vmem:[#allocation2 + $0x15] sm:$0xff]  ;;  %v372_v5 = vmax.f32 %v370_v58, 0.0 }
  0xb7   : > { %v1870_v54 = vld [vmem:[#allocation2 + $0xe] sm:$0xff]  ;;  %v1874_v2 = vld [vmem:[#allocation2 + $0x16] sm:$0xff]  ;;  %v593_v4 = vld [vmem:[#allocation2 + $0x6] sm:$0xff] }
  0xb8   : > { %v598_v55 = vld [vmem:[#allocation2 + $0xf] sm:$0xff]  ;;  %v584_v33 = vadd.f32 %v582_v44, %v580_v32  ;;  %v587_v60 = vadd.f32 %v585_v16, %v583_v52  ;;  %v597_v8 = vld [vmem:[#allocation2 + $0x7] sm:$0xff]  ;;  %v374_v9 = vmin.f32 %v372_v5, 255.0 }
  0xb9   : > { %754 = vst.msk [vmem:[#allocation2 + $0xf] sm:$0xff] %vm560_vm0, %v557_v46  ;;  %v559_v46 = vsub.f32 %v383_v24, %v553_v26 }
  0xba   : > { %v588_v35 = vadd.f32 %v1866_v34, %v584_v33  ;;  %v591_v19 = vadd.f32 %v589_v47, %v587_v60  ;;  %v556_v13 = vsub.f32 %v374_v9, %v544_v3 }
  0xbc   : > { %v592_v39 = vadd.f32 %v1868_v53, %v588_v35  ;;  %v595_v10 = vadd.f32 %v593_v4, %v591_v19  ;;  %753 = vst.msk [vmem:[#allocation2 + $0x7] sm:$0xff] %vm560_vm0, %v556_v13 }
  0xbe   : > { %v596_v11 = vadd.f32 %v1870_v54, %v592_v39  ;;  %v599_v17 = vadd.f32 %v597_v8, %v595_v10 }
  0xc0   : > { %v600_v22 = vadd.f32 %v598_v55, %v596_v11  ;;  %v602_v63 = vadd.f32 %v599_v17, %v572_v28  ;;  %v782_v55 = vld [vmem:[#allocation2 + $0xf] sm:$0xff] }
  0xc1   : > { %v791_v56 = vld [vmem:[#allocation2 + $0x12] sm:$0xff] }
  0xc2   : > { %v603_v15 = vadd.f32 %v601_v57, %v600_v22  ;;  %v605_v23 = vadd.f32 %v602_v63, %v574_v29  ;;  %v788_v57 = vld [vmem:[#allocation2 + $0x11] sm:$0xff] }
  0xc3   : > { %v755_v43 = vld [vmem:[#allocation2] sm:$0xff]  ;;  %v756_v12 = vld [vmem:[#allocation2 + $0x8] sm:$0xff]  ;;  %v794_v25 = vld [vmem:[#allocation2 + $0x13] sm:$0xff] }
  0xc4   : > { %v606_v30 = vadd.f32 %v604_v59, %v603_v15  ;;  %v608_v40 = vadd.f32 %v605_v23, %v1863_v37  ;;  %v757_v0 = vld [vmem:[#allocation2 + $0x1] sm:$0xff]  ;;  %v758_v16 = vld [vmem:[#allocation2 + $0x9] sm:$0xff]  ;;  %v1887_v33 = vld [vmem:[#allocation2 + $0x14] sm:$0xff] }
  0xc5   : > { %v759_v47 = vadd.f32 %v757_v0, %v755_v43  ;;  %v761_v28 = vld [vmem:[#allocation2 + $0x2] sm:$0xff]  ;;  %v1882_v49 = vld [vmem:[#allocation2 + $0xa] sm:$0xff]  ;;  %v760_v50 = vadd.f32 %v758_v16, %v756_v12  ;;  %v1889_v58 = vld [vmem:[#allocation2 + $0x15] sm:$0xff] }
  0xc6   : > { %v609_v41 = vadd.f32 %v607_v18, %v606_v30  ;;  %v611_v42 = vadd.f32 %v608_v40, %v582_v44  ;;  %v765_v51 = vld [vmem:[#allocation2 + $0x3] sm:$0xff]  ;;  %v1885_v52 = vld [vmem:[#allocation2 + $0xb] sm:$0xff]  ;;  %v1891_v59 = vld [vmem:[#allocation2 + $0x16] sm:$0xff] }
  0xc7   : > { %v769_v37 = vld [vmem:[#allocation2 + $0x4] sm:$0xff]  ;;  %v785_v44 = vld [vmem:[#allocation2 + $0x10] sm:$0xff]  ;;  %v764_v4 = vadd.f32 %v1882_v49, %v760_v50 }
  0xc8   : > { %v612_v32 = vadd.f32 %v610_v31, %v609_v41  ;;  %v614_v29 = vadd.f32 %v611_v42, %v1866_v34  ;;  %v763_v31 = vadd.f32 %v761_v28, %v759_v47  ;;  %v770_v60 = vld [vmem:[#allocation2 + $0xc] sm:$0xff] }
  0xc9   : > { %v773_v34 = vld [vmem:[#allocation2 + $0x5] sm:$0xff]  ;;  %v774_v3 = vld [vmem:[#allocation2 + $0xd] sm:$0xff]  ;;  %v768_v38 = vadd.f32 %v1885_v52, %v764_v4 }
  0xca   : > { %v615_v18 = vadd.f32 %v613_v62, %v612_v32  ;;  %v617_v35 = vadd.f32 %v614_v29, %v1868_v53  ;;  %v777_v5 = vld [vmem:[#allocation2 + $0x6] sm:$0xff]  ;;  %v1895_v6 = vld [vmem:[#allocation2 + $0xe] sm:$0xff]  ;;  %v767_v7 = vadd.f32 %v765_v51, %v763_v31 }
  0xcb   : > { %v781_v48 = vld [vmem:[#allocation2 + $0x7] sm:$0xff]  ;;  %937 = vst.msk [vmem:[#allocation2 + $0xf] sm:$0xff] %vm560_vm0, %v559_v46  ;;  %v772_v8 = vadd.f32 %v770_v60, %v768_v38 }
  0xcc   : > { %v618_v19 = vadd.f32 %v1872_v36, %v615_v18  ;;  %936 = vst.msk [vmem:[#allocation2 + $0x7] sm:$0xff] %vm560_vm0, %v558_v45  ;;  %v620_v62 = vadd.f32 %v617_v35, %v1870_v54  ;;  %v771_v39 = vadd.f32 %v769_v37, %v767_v7 }
  0xcd   : > { %v776_v10 = vadd.f32 %v774_v3, %v772_v8 }
  0xce   : > { %624 = vrot.lane.b32.xlu0 %v620_v62, %s1516_s19  ;;  %v621_v53 = vadd.f32 %v1874_v2, %v618_v19  ;;  %v775_v9 = vadd.f32 %v773_v34, %v771_v39 }
  0xcf   : > { %v780_v36 = vadd.f32 %v1895_v6, %v776_v10 }
  0xd0   : > { %v779_v11 = vadd.f32 %v777_v5, %v775_v9 }
  0xd1   : > { %v784_v63 = vadd.f32 %v782_v55, %v780_v36 }
  0xd2   : > { %626 = vrot.lane.b32.xlu0 %v621_v53, %s1516_s19  ;;  %v783_v54 = vadd.f32 %v781_v48, %v779_v11  ;;  %v965_v34 = vld [vmem:[#allocation2 + $0xf] sm:$0xff] }
  0xd3   : > { %v938_v13 = vld [vmem:[#allocation2] sm:$0xff]  ;;  %v939_v14 = vld [vmem:[#allocation2 + $0x8] sm:$0xff]  ;;  %v787_v27 = vadd.f32 %v785_v44, %v784_v63  ;;  %v968_v5 = vld [vmem:[#allocation2 + $0x10] sm:$0xff] }
  0xd4   : > { %v940_v17 = vld [vmem:[#allocation2 + $0x1] sm:$0xff]  ;;  %v941_v61 = vld [vmem:[#allocation2 + $0x9] sm:$0xff]  ;;  %v786_v2 = vadd.f32 %v783_v54, %v756_v12  ;;  %v971_v7 = vld [vmem:[#allocation2 + $0x11] sm:$0xff] }
  0xd5   : > { %v942_v20 = vadd.f32 %v940_v17, %v938_v13  ;;  %v944_v21 = vld [vmem:[#allocation2 + $0x2] sm:$0xff]  ;;  %v945_v22 = vld [vmem:[#allocation2 + $0xa] sm:$0xff]  ;;  %v943_v15 = vadd.f32 %v941_v61, %v939_v14  ;;  %v790_v43 = vadd.f32 %v788_v57, %v787_v27  ;;  %v974_v38 = vld [vmem:[#allocation2 + $0x12] sm:$0xff] }
  0xd6   : > { %v948_v1 = vld [vmem:[#allocation2 + $0x3] sm:$0xff]  ;;  %v949_v24 = vld [vmem:[#allocation2 + $0xb] sm:$0xff]  ;;  %v789_v40 = vadd.f32 %v786_v2, %v758_v16  ;;  %v977_v53 = vld [vmem:[#allocation2 + $0x13] sm:$0xff] }
  0xd7   : > { %v946_v23 = vadd.f32 %v944_v21, %v942_v20  ;;  %v947_v26 = vadd.f32 %v945_v22, %v943_v15  ;;  %v952_v30 = vld [vmem:[#allocation2 + $0x4] sm:$0xff]  ;;  %v953_v42 = vld [vmem:[#allocation2 + $0xc] sm:$0xff]  ;;  %v793_v28 = vadd.f32 %v791_v56, %v790_v43  ;;  %v986_v13 = vld [vmem:[#allocation2 + $0x16] sm:$0xff] }
  0xd8   : > { %v956_v45 = vld [vmem:[#allocation2 + $0x5] sm:$0xff]  ;;  %v792_v46 = vadd.f32 %v789_v40, %v1882_v49  ;;  %v957_v47 = vld [vmem:[#allocation2 + $0xd] sm:$0xff] }
  0xd9   : > { %v950_v41 = vadd.f32 %v948_v1, %v946_v23  ;;  %v951_v0 = vadd.f32 %v949_v24, %v947_v26  ;;  %v960_v50 = vld [vmem:[#allocation2 + $0x6] sm:$0xff]  ;;  %v961_v37 = vld [vmem:[#allocation2 + $0xe] sm:$0xff]  ;;  %v796_v55 = vadd.f32 %v794_v25, %v793_v28 }
  0xda   : > { %v795_v12 = vadd.f32 %v792_v46, %v1885_v52  ;;  %v964_v18 = vld [vmem:[#allocation2 + $0x7] sm:$0xff] }
  0xdb   : > { %v954_v32 = vadd.f32 %v952_v30, %v950_v41  ;;  %v955_v29 = vadd.f32 %v953_v42, %v951_v0  ;;  %v799_v57 = vadd.f32 %v1887_v33, %v796_v55 }
  0xdc   : > { %v798_v16 = vadd.f32 %v795_v12, %v770_v60 }
  0xdd   : > { %v958_v51 = vadd.f32 %v956_v45, %v954_v32  ;;  %v959_v44 = vadd.f32 %v957_v47, %v955_v29  ;;  %v802_v56 = vadd.f32 %v1889_v58, %v799_v57  ;;  %v980_v58 = vld [vmem:[#allocation2 + $0x14] sm:$0xff] }
  0xde   : > { %v801_v4 = vadd.f32 %v798_v16, %v774_v3 }
  0xdf   : > { %v962_v31 = vadd.f32 %v960_v50, %v958_v51  ;;  %v963_v35 = vadd.f32 %v961_v37, %v959_v44  ;;  %v805_v25 = vadd.f32 %v1891_v59, %v802_v56 }
  0xe0   : > { %v804_v19 = vadd.f32 %v801_v4, %v1895_v6  ;;  %v983_v6 = vld [vmem:[#allocation2 + $0x15] sm:$0xff] }
  0xe1   : > { %v966_v49 = vadd.f32 %v964_v18, %v962_v31  ;;  %v967_v48 = vadd.f32 %v965_v34, %v963_v35 }
  0xe2   : > { %808 = vrot.lane.b32.xlu1 %v804_v19, %s1516_s19 }
  0xe3   : > { %v969_v52 = vadd.f32 %v966_v49, %v939_v14  ;;  %v970_v62 = vadd.f32 %v968_v5, %v967_v48 }
  0xe5   : > { %v972_v60 = vadd.f32 %v969_v52, %v941_v61  ;;  %v973_v39 = vadd.f32 %v971_v7, %v970_v62 }
  0xe6   : > { %810 = vrot.lane.b32.xlu1 %v805_v25, %s1516_s19 }
  0xe7   : > { %v975_v33 = vadd.f32 %v972_v60, %v945_v22  ;;  %v976_v3 = vadd.f32 %v974_v38, %v973_v39 }
  0xe9   : > { %v978_v8 = vadd.f32 %v975_v33, %v949_v24  ;;  %v979_v9 = vadd.f32 %v977_v53, %v976_v3 }
  0xeb   : > { %v981_v10 = vadd.f32 %v978_v8, %v953_v42  ;;  %v982_v11 = vadd.f32 %v980_v58, %v979_v9 }
  0xed   : > { %v984_v36 = vadd.f32 %v981_v10, %v957_v47  ;;  %v985_v14 = vadd.f32 %v983_v6, %v982_v11 }
  0xef   : > { %v987_v17 = vadd.f32 %v984_v36, %v961_v37  ;;  %v988_v54 = vadd.f32 %v986_v13, %v985_v14 }
  0xf1   : > { %991 = vrot.lane.b32.xlu0 %v987_v17, %s1516_s19  ;;  %993 = vrot.lane.b32.xlu1 %v988_v54, %s1516_s19  ;;  %s1252_s19 = sshll.u32 %s1568_s13, 7  ;;  %s1531_s13 = smov [#allocation9]  }
 0x140   : > { %v625_v59 = vpop.permute.xlu0 %624 }
 0x141   : > { %631 = vst.msk [vmem:[#allocation3] sm:$0xff] %vm630_vm15, %v625_v59 }
 0x144   : > { %v627_v61 = vpop.permute.xlu0 %626 }
 0x145   : > { %632 = vst.msk [vmem:[#allocation3 + $0x8] sm:$0xff] %vm630_vm15, %v627_v61 }
 0x148   : > { %v1918_v20 = vld [vmem:[#allocation3] sm:$0xff] }
 0x149   : > { %637 = vrot.lane.b32.xlu0 %v1918_v20, %s1517_s4 }
 0x14c   : > { %v1922_v21 = vld [vmem:[#allocation3 + $0x8] sm:$0xff] }
 0x14d   : > { %645 = vrot.lane.b32.xlu0 %v1918_v20, %s1518_s5  ;;  %639 = vrot.lane.b32.xlu1 %v1922_v21, %s1517_s4 }
 0x151   : > { %653 = vrot.lane.b32.xlu0 %v1918_v20, %s1519_s8  ;;  %647 = vrot.lane.b32.xlu1 %v1922_v21, %s1518_s5 }
 0x154   : > { %v809_v22 = vpop.permute.xlu1 %808 }
 0x155   : > { %661 = vrot.lane.b32.xlu0 %v1918_v20, %s1520_s16  ;;  %655 = vrot.lane.b32.xlu1 %v1922_v21, %s1519_s8  ;;  %814 = vst.msk [vmem:[#allocation3] sm:$0xff] %vm630_vm15, %v809_v22 }
 0x158   : > { %v811_v63 = vpop.permute.xlu1 %810 }
 0x159   : > { %669 = vrot.lane.b32.xlu0 %v1918_v20, %s1521_s27  ;;  %663 = vrot.lane.b32.xlu1 %v1922_v21, %s1520_s16  ;;  %815 = vst.msk [vmem:[#allocation3 + $0x8] sm:$0xff] %vm630_vm15, %v811_v63 }
 0x15c   : > { %v1950_v15 = vld [vmem:[#allocation3] sm:$0xff] }
 0x15d   : > { %677 = vrot.lane.b32.xlu0 %v1918_v20, %s1522_s23  ;;  %671 = vrot.lane.b32.xlu1 %v1922_v21, %s1521_s27 }
 0x160   : > { %v1952_v2 = vld [vmem:[#allocation3 + $0x8] sm:$0xff] }
 0x161   : > { %685 = vrot.lane.b32.xlu0 %v1918_v20, %s1523_s25  ;;  %679 = vrot.lane.b32.xlu1 %v1922_v21, %s1522_s23 }
 0x163   : > { %v992_v1 = vpop.permute.xlu0 %991  ;;  %v994_v23 = vpop.permute.xlu1 %993 }
 0x164   : > { %997 = vst.msk [vmem:[#allocation3] sm:$0xff] %vm630_vm15, %v992_v1  ;;  %998 = vst.msk [vmem:[#allocation3 + $0x8] sm:$0xff] %vm630_vm15, %v994_v23 }
 0x165   : > { %693 = vrot.lane.b32.xlu0 %v1918_v20, %s1524_s26  ;;  %687 = vrot.lane.b32.xlu1 %v1922_v21, %s1523_s25 }
 0x169   : > { %701 = vrot.lane.b32.xlu0 %v1918_v20, %s1525_s24  ;;  %695 = vrot.lane.b32.xlu1 %v1922_v21, %s1524_s26 }
 0x16b   : > { %v2040_v24 = vld [vmem:[#allocation3] sm:$0xff]  ;;  %v2046_v27 = vld [vmem:[#allocation3 + $0x8] sm:$0xff] }
 0x16d   : > { %709 = vrot.lane.b32.xlu0 %v1918_v20, %s1526_s6  ;;  %703 = vrot.lane.b32.xlu1 %v1922_v21, %s1525_s24 }
 0x171   : > { %717 = vrot.lane.b32.xlu0 %v1918_v20, %s1527_s7  ;;  %711 = vrot.lane.b32.xlu1 %v1922_v21, %s1526_s6 }
 0x175   : > { %725 = vrot.lane.b32.xlu0 %v1918_v20, %s1528_s14  ;;  %719 = vrot.lane.b32.xlu1 %v1922_v21, %s1527_s7 }
 0x179   : > { %733 = vrot.lane.b32.xlu0 %v1918_v20, %s1529_s3  ;;  %727 = vrot.lane.b32.xlu1 %v1922_v21, %s1528_s14 }
 0x17d   : > { %741 = vrot.lane.b32.xlu0 %v1918_v20, %s1530_s17  ;;  %735 = vrot.lane.b32.xlu1 %v1922_v21, %s1529_s3 }
 0x181   : > { %743 = vrot.lane.b32.xlu1 %v1922_v21, %s1530_s17  ;;  %820 = vrot.lane.b32.xlu0 %v1950_v15, %s1517_s4 }
 0x185   : > { %828 = vrot.lane.b32.xlu0 %v1950_v15, %s1518_s5  ;;  %822 = vrot.lane.b32.xlu1 %v1952_v2, %s1517_s4 }
 0x189   : > { %836 = vrot.lane.b32.xlu0 %v1950_v15, %s1519_s8  ;;  %830 = vrot.lane.b32.xlu1 %v1952_v2, %s1518_s5 }
 0x18d   : > { %844 = vrot.lane.b32.xlu0 %v1950_v15, %s1520_s16  ;;  %838 = vrot.lane.b32.xlu1 %v1952_v2, %s1519_s8 }
 0x191   : > { %852 = vrot.lane.b32.xlu0 %v1950_v15, %s1521_s27  ;;  %846 = vrot.lane.b32.xlu1 %v1952_v2, %s1520_s16 }
 0x195   : > { %860 = vrot.lane.b32.xlu0 %v1950_v15, %s1522_s23  ;;  %854 = vrot.lane.b32.xlu1 %v1952_v2, %s1521_s27 }
 0x199   : > { %868 = vrot.lane.b32.xlu0 %v1950_v15, %s1523_s25  ;;  %862 = vrot.lane.b32.xlu1 %v1952_v2, %s1522_s23 }
 0x19d   : > { %876 = vrot.lane.b32.xlu0 %v1950_v15, %s1524_s26  ;;  %870 = vrot.lane.b32.xlu1 %v1952_v2, %s1523_s25 }
 0x1a1   : > { %884 = vrot.lane.b32.xlu0 %v1950_v15, %s1525_s24  ;;  %878 = vrot.lane.b32.xlu1 %v1952_v2, %s1524_s26 }
 0x1a5   : > { %892 = vrot.lane.b32.xlu0 %v1950_v15, %s1526_s6  ;;  %886 = vrot.lane.b32.xlu1 %v1952_v2, %s1525_s24 }
 0x1a9   : > { %900 = vrot.lane.b32.xlu0 %v1950_v15, %s1527_s7  ;;  %894 = vrot.lane.b32.xlu1 %v1952_v2, %s1526_s6 }
 0x1ad   : > { %908 = vrot.lane.b32.xlu0 %v1950_v15, %s1528_s14  ;;  %902 = vrot.lane.b32.xlu1 %v1952_v2, %s1527_s7 }
 0x1b1   : > { %916 = vrot.lane.b32.xlu0 %v1950_v15, %s1529_s3  ;;  %910 = vrot.lane.b32.xlu1 %v1952_v2, %s1528_s14 }
 0x1b5   : > { %924 = vrot.lane.b32.xlu0 %v1950_v15, %s1530_s17  ;;  %918 = vrot.lane.b32.xlu1 %v1952_v2, %s1529_s3 }
 0x1b9   : > { %1003 = vrot.lane.b32.xlu0 %v2040_v24, %s1517_s4  ;;  %926 = vrot.lane.b32.xlu1 %v1952_v2, %s1530_s17 }
 0x1bb   : > { %v638_v26 = vpop.permute.xlu0 %637 }
 0x1bc   : > { %v643_v30 = vadd.f32 %v638_v26, %v1918_v20 }
 0x1bd   : > { %1011 = vrot.lane.b32.xlu0 %v2040_v24, %s1518_s5  ;;  %1005 = vrot.lane.b32.xlu1 %v2046_v27, %s1517_s4 }
 0x1bf   : > { %v646_v40 = vpop.permute.xlu0 %645  ;;  %v640_v41 = vpop.permute.xlu1 %639 }
 0x1c0   : > { %v651_v42 = vadd.f32 %v646_v40, %v643_v30  ;;  %v644_v43 = vadd.f32 %v640_v41, %v1922_v21 }
 0x1c1   : > { %1019 = vrot.lane.b32.xlu0 %v2040_v24, %s1519_s8  ;;  %1013 = vrot.lane.b32.xlu1 %v2046_v27, %s1518_s5 }
 0x1c3   : > { %v654_v0 = vpop.permute.xlu0 %653  ;;  %v648_v45 = vpop.permute.xlu1 %647 }
 0x1c4   : > { %v659_v46 = vadd.f32 %v654_v0, %v651_v42  ;;  %v652_v32 = vadd.f32 %v648_v45, %v644_v43 }
 0x1c5   : > { %1027 = vrot.lane.b32.xlu0 %v2040_v24, %s1520_s16  ;;  %1021 = vrot.lane.b32.xlu1 %v2046_v27, %s1519_s8 }
 0x1c7   : > { %v662_v47 = vpop.permute.xlu0 %661  ;;  %v656_v28 = vpop.permute.xlu1 %655 }
 0x1c8   : > { %v667_v29 = vadd.f32 %v662_v47, %v659_v46  ;;  %v660_v50 = vadd.f32 %v656_v28, %v652_v32 }
 0x1c9   : > { %1035 = vrot.lane.b32.xlu0 %v2040_v24, %s1521_s27  ;;  %1029 = vrot.lane.b32.xlu1 %v2046_v27, %s1520_s16  ;;  %s2117_s16 = scalar_lea.hbm %s2161_s2, %s1252_s19 }
 0x1cb   : > { %v670_v12 = vpop.permute.xlu0 %669  ;;  %v664_v51 = vpop.permute.xlu1 %663 }
 0x1cc   : > { %v675_v37 = vadd.f32 %v670_v12, %v667_v29  ;;  %v668_v55 = vadd.f32 %v664_v51, %v660_v50 }
 0x1cd   : > { %1043 = vrot.lane.b32.xlu0 %v2040_v24, %s1522_s23  ;;  %1037 = vrot.lane.b32.xlu1 %v2046_v27, %s1521_s27  ;;  %s1134_s27 = scalar_lea.sflag [#allocation6], %s1701_s30 }
 0x1cf   : > { %v678_v44 = vpop.permute.xlu0 %677  ;;  %v672_v18 = vpop.permute.xlu1 %671 }
 0x1d0   : > { %v683_v16 = vadd.f32 %v678_v44, %v675_v37  ;;  %v676_v31 = vadd.f32 %v672_v18, %v668_v55 }
 0x1d1   : > { %1051 = vrot.lane.b32.xlu0 %v2040_v24, %s1523_s25  ;;  %1045 = vrot.lane.b32.xlu1 %v2046_v27, %s1522_s23  ;;  %s1439_s23 = scalar_lea.vmem %s2112_s29, 128 }
 0x1d2   : > { %p1440_p13 = scmp.ne.s32.totalorder %s2112_s29, %s1439_s23 }
 0x1d3   : > { %v686_v34 = vpop.permute.xlu0 %685  ;;  %v680_v57 = vpop.permute.xlu1 %679 }
 0x1d4   : > { %v691_v35 = vadd.f32 %v686_v34, %v683_v16  ;;  %v684_v4 = vadd.f32 %v680_v57, %v676_v31  ;;  %p1441_p12 = pnand %p1440_p13, %p2170_p1 }
 0x1d5   : > { %1059 = vrot.lane.b32.xlu0 %v2040_v24, %s1524_s26  ;;  %1053 = vrot.lane.b32.xlu1 %v2046_v27, %s1523_s25  ;;  %s1443_s25 = sshll.u32 %s1531_s13, 4  ;;  %s1444_s25 = int_to_ptr.vmem [resolvable:$false] %s1443_s25 }
 0x1d6   : > { %p1442_p10 = pneg %p1441_p12  ;;  %p1446_p5 = scmp.lt.s32.totalorder %s2112_s29, %s1444_s25 }
 0x1d7   : > { %v694_v49 = vpop.permute.xlu0 %693  ;;  %v688_v5 = vpop.permute.xlu1 %687 }
 0x1d8   : > { %v699_v56 = vadd.f32 %v694_v49, %v691_v35  ;;  %v692_v48 = vadd.f32 %v688_v5, %v684_v4 }
 0x1d9   : > { %1067 = vrot.lane.b32.xlu0 %v2040_v24, %s1525_s24  ;;  %1061 = vrot.lane.b32.xlu1 %v2046_v27, %s1524_s26  ;;  %s1445_s26 = scalar_lea.vmem %s1444_s25, 256 }
 0x1da   : > { %p1447_p7 = scmp.lt.s32.totalorder %s1445_s26, %s1439_s23 }
 0x1db   : > { %v702_v19 = vpop.permute.xlu0 %701  ;;  %v696_v52 = vpop.permute.xlu1 %695 }
 0x1dc   : > { %v707_v7 = vadd.f32 %v702_v19, %v699_v56  ;;  %v700_v62 = vadd.f32 %v696_v52, %v692_v48  ;;  %p1448_p9 = por %p1447_p7, %p1446_p5 }
 0x1dd   : > { %1075 = vrot.lane.b32.xlu0 %v2040_v24, %s1526_s6  ;;  %1069 = vrot.lane.b32.xlu1 %v2046_v27, %s1525_s24 }
 0x1de   : > { %p1449_p11 = pnand %p1448_p9, %p1442_p10 }
 0x1df   : > { %v710_v25 = vpop.permute.xlu0 %709  ;;  %v704_v60 = vpop.permute.xlu1 %703 }
 0x1e0   : > { %v715_v38 = vadd.f32 %v710_v25, %v707_v7  ;;  %v708_v39 = vadd.f32 %v704_v60, %v700_v62 }
 0x1e1   : > { %1083 = vrot.lane.b32.xlu0 %v2040_v24, %s1527_s7  ;;  %1077 = vrot.lane.b32.xlu1 %v2046_v27, %s1526_s6 }
 0x1e3   : > { %v718_v33 = vpop.permute.xlu0 %717  ;;  %v712_v53 = vpop.permute.xlu1 %711 }
 0x1e4   : > { %v723_v3 = vadd.f32 %v718_v33, %v715_v38  ;;  %v716_v8 = vadd.f32 %v712_v53, %v708_v39 }
 0x1e5   : > { %1091 = vrot.lane.b32.xlu0 %v2040_v24, %s1528_s14  ;;  %1085 = vrot.lane.b32.xlu1 %v2046_v27, %s1527_s7 }
 0x1e7   : > { %v726_v58 = vpop.permute.xlu0 %725  ;;  %v720_v9 = vpop.permute.xlu1 %719 }
 0x1e8   : > { %v731_v10 = vadd.f32 %v726_v58, %v723_v3  ;;  %v724_v6 = vadd.f32 %v720_v9, %v716_v8 }
 0x1e9   : > { %1099 = vrot.lane.b32.xlu0 %v2040_v24, %s1529_s3  ;;  %1093 = vrot.lane.b32.xlu1 %v2046_v27, %s1528_s14 }
 0x1eb   : > { %v734_v11 = vpop.permute.xlu0 %733  ;;  %v728_v36 = vpop.permute.xlu1 %727 }
 0x1ec   : > { %v739_v13 = vadd.f32 %v734_v11, %v731_v10  ;;  %v732_v14 = vadd.f32 %v728_v36, %v724_v6 }
 0x1ed   : > { %1107 = vrot.lane.b32.xlu0 %v2040_v24, %s1530_s17  ;;  %1101 = vrot.lane.b32.xlu1 %v2046_v27, %s1529_s3 }
 0x1ef   : > { %v742_v17 = vpop.permute.xlu0 %741  ;;  %v736_v54 = vpop.permute.xlu1 %735 }
 0x1f0   : > { %v747_v59 = vadd.f32 %v742_v17, %v739_v13  ;;  %v740_v61 = vadd.f32 %v736_v54, %v732_v14 }
 0x1f1   : > { %1109 = vrot.lane.b32.xlu1 %v2046_v27, %s1530_s17 }
 0x1f2   : > { %v749_v36 = vmul.f32 %v747_v59, %v747_v59 }
 0x1f3   : > { %v821_v20 = vpop.permute.xlu0 %820  ;;  %v744_v21 = vpop.permute.xlu1 %743 }
 0x1f4   : > { %v748_v22 = vadd.f32 %v744_v21, %v740_v61  ;;  %v826_v63 = vadd.f32 %v821_v20, %v1950_v15 }
 0x1f6   : > { %v750_v21 = vmul.f32 %v748_v22, %v748_v22 }
 0x1f7   : > { %v829_v1 = vpop.permute.xlu0 %828  ;;  %v823_v23 = vpop.permute.xlu1 %822 }
 0x1f8   : > { %v834_v26 = vadd.f32 %v829_v1, %v826_v63  ;;  %v827_v30 = vadd.f32 %v823_v23, %v1952_v2 }
 0x1fb   : > { %v837_v40 = vpop.permute.xlu0 %836  ;;  %v831_v41 = vpop.permute.xlu1 %830 }
 0x1fc   : > { %v842_v42 = vadd.f32 %v837_v40, %v834_v26  ;;  %v835_v43 = vadd.f32 %v831_v41, %v827_v30 }
 0x1ff   : > { %v845_v0 = vpop.permute.xlu0 %844  ;;  %v839_v45 = vpop.permute.xlu1 %838 }
 0x200   : > { %v850_v46 = vadd.f32 %v845_v0, %v842_v42  ;;  %v843_v32 = vadd.f32 %v839_v45, %v835_v43 }
 0x203   : > { %v853_v47 = vpop.permute.xlu0 %852  ;;  %v847_v28 = vpop.permute.xlu1 %846 }
 0x204   : > { %v858_v29 = vadd.f32 %v853_v47, %v850_v46  ;;  %v851_v50 = vadd.f32 %v847_v28, %v843_v32 }
 0x207   : > { %v861_v12 = vpop.permute.xlu0 %860  ;;  %v855_v51 = vpop.permute.xlu1 %854 }
 0x208   : > { %v866_v15 = vadd.f32 %v861_v12, %v858_v29  ;;  %v859_v37 = vadd.f32 %v855_v51, %v851_v50 }
 0x20b   : > { %v869_v55 = vpop.permute.xlu0 %868  ;;  %v863_v44 = vpop.permute.xlu1 %862 }
 0x20c   : > { %v874_v18 = vadd.f32 %v869_v55, %v866_v15  ;;  %v867_v2 = vadd.f32 %v863_v44, %v859_v37 }
 0x20f   : > { %v877_v16 = vpop.permute.xlu0 %876  ;;  %v871_v31 = vpop.permute.xlu1 %870 }
 0x210   : > { %v882_v34 = vadd.f32 %v877_v16, %v874_v18  ;;  %v875_v57 = vadd.f32 %v871_v31, %v867_v2 }
 0x213   : > { %v885_v35 = vpop.permute.xlu0 %884  ;;  %v879_v4 = vpop.permute.xlu1 %878 }
 0x214   : > { %v890_v49 = vadd.f32 %v885_v35, %v882_v34  ;;  %v883_v5 = vadd.f32 %v879_v4, %v875_v57 }
 0x217   : > { %v893_v56 = vpop.permute.xlu0 %892  ;;  %v887_v48 = vpop.permute.xlu1 %886 }
 0x218   : > { %v891_v19 = vadd.f32 %v887_v48, %v883_v5  ;;  %v898_v60 = vadd.f32 %v893_v56, %v890_v49 }
 0x21b   : > { %v901_v52 = vpop.permute.xlu0 %900  ;;  %v895_v7 = vpop.permute.xlu1 %894 }
 0x21c   : > { %v906_v38 = vadd.f32 %v901_v52, %v898_v60  ;;  %v899_v53 = vadd.f32 %v895_v7, %v891_v19 }
 0x21f   : > { %v909_v62 = vpop.permute.xlu0 %908  ;;  %v903_v25 = vpop.permute.xlu1 %902 }
 0x220   : > { %v914_v3 = vadd.f32 %v909_v62, %v906_v38  ;;  %v907_v8 = vadd.f32 %v903_v25, %v899_v53 }
 0x223   : > { %v917_v39 = vpop.permute.xlu0 %916  ;;  %v911_v33 = vpop.permute.xlu1 %910 }
 0x224   : > { %v922_v58 = vadd.f32 %v917_v39, %v914_v3  ;;  %v915_v6 = vadd.f32 %v911_v33, %v907_v8 }
 0x227   : > { %v925_v9 = vpop.permute.xlu0 %924  ;;  %v919_v10 = vpop.permute.xlu1 %918 }
 0x228   : > { %v930_v11 = vadd.f32 %v925_v9, %v922_v58  ;;  %v923_v14 = vadd.f32 %v919_v10, %v915_v6 }
 0x22a   : > { %v932_v13 = vmul.f32 %v930_v11, %v930_v11 }
 0x22b   : > { %v1004_v17 = vpop.permute.xlu0 %1003  ;;  %v927_v54 = vpop.permute.xlu1 %926 }
 0x22c   : > { %v934_v61 = vadd.f32 %v932_v13, %v749_v36  ;;  %v931_v20 = vadd.f32 %v927_v54, %v923_v14  ;;  %v1009_v47 = vadd.f32 %v1004_v17, %v2040_v24 }
 0x22e   : > { %v933_v63 = vmul.f32 %v931_v20, %v931_v20 }
 0x22f   : > { %v1012_v1 = vpop.permute.xlu0 %1011  ;;  %v1006_v23 = vpop.permute.xlu1 %1005 }
 0x230   : > { %v935_v26 = vadd.f32 %v933_v63, %v750_v21  ;;  %v1017_v50 = vadd.f32 %v1012_v1, %v1009_v47  ;;  %v1010_v22 = vadd.f32 %v1006_v23, %v2046_v27 }
 0x233   : > { %v1020_v30 = vpop.permute.xlu0 %1019  ;;  %v1014_v40 = vpop.permute.xlu1 %1013 }
 0x234   : > { %v1025_v12 = vadd.f32 %v1020_v30, %v1017_v50  ;;  %v1018_v37 = vadd.f32 %v1014_v40, %v1010_v22 }
 0x237   : > { %v1028_v41 = vpop.permute.xlu0 %1027  ;;  %v1022_v42 = vpop.permute.xlu1 %1021 }
 0x238   : > { %v1033_v55 = vadd.f32 %v1028_v41, %v1025_v12  ;;  %v1026_v44 = vadd.f32 %v1022_v42, %v1018_v37 }
 0x23b   : > { %v1036_v43 = vpop.permute.xlu0 %1035  ;;  %v1030_v0 = vpop.permute.xlu1 %1029 }
 0x23c   : > { %v1041_v18 = vadd.f32 %v1036_v43, %v1033_v55  ;;  %v1034_v31 = vadd.f32 %v1030_v0, %v1026_v44 }
 0x23f   : > { %v1044_v45 = vpop.permute.xlu0 %1043  ;;  %v1038_v46 = vpop.permute.xlu1 %1037 }
 0x240   : > { %v1049_v34 = vadd.f32 %v1044_v45, %v1041_v18  ;;  %v1042_v57 = vadd.f32 %v1038_v46, %v1034_v31 }
 0x243   : > { %v1052_v59 = vpop.permute.xlu0 %1051  ;;  %v1046_v32 = vpop.permute.xlu1 %1045 }
 0x244   : > { %v1057_v35 = vadd.f32 %v1052_v59, %v1049_v34  ;;  %v1050_v49 = vadd.f32 %v1046_v32, %v1042_v57 }
 0x247   : > { %v1060_v28 = vpop.permute.xlu0 %1059  ;;  %v1054_v29 = vpop.permute.xlu1 %1053 }
 0x248   : > { %v1065_v5 = vadd.f32 %v1060_v28, %v1057_v35  ;;  %v1058_v56 = vadd.f32 %v1054_v29, %v1050_v49 }
 0x24b   : > { %v1068_v51 = vpop.permute.xlu0 %1067  ;;  %v1062_v15 = vpop.permute.xlu1 %1061 }
 0x24c   : > { %v1073_v48 = vadd.f32 %v1068_v51, %v1065_v5  ;;  %v1066_v52 = vadd.f32 %v1062_v15, %v1058_v56 }
 0x24f   : > { %v1076_v2 = vpop.permute.xlu0 %1075  ;;  %v1070_v16 = vpop.permute.xlu1 %1069 }
 0x250   : > { %v1081_v7 = vadd.f32 %v1076_v2, %v1073_v48  ;;  %v1074_v62 = vadd.f32 %v1070_v16, %v1066_v52 }
 0x253   : > { %v1084_v4 = vpop.permute.xlu0 %1083  ;;  %v1078_v24 = vpop.permute.xlu1 %1077 }
 0x254   : > { %v1089_v25 = vadd.f32 %v1084_v4, %v1081_v7  ;;  %v1082_v39 = vadd.f32 %v1078_v24, %v1074_v62 }
 0x257   : > { %v1092_v27 = vpop.permute.xlu0 %1091  ;;  %v1086_v19 = vpop.permute.xlu1 %1085 }
 0x258   : > { %v1097_v33 = vadd.f32 %v1092_v27, %v1089_v25  ;;  %v1090_v53 = vadd.f32 %v1086_v19, %v1082_v39 }
 0x25b   : > { %v1100_v60 = vpop.permute.xlu0 %1099  ;;  %v1094_v38 = vpop.permute.xlu1 %1093 }
 0x25c   : > { %v1105_v3 = vadd.f32 %v1100_v60, %v1097_v33  ;;  %v1098_v9 = vadd.f32 %v1094_v38, %v1090_v53 }
 0x25f   : > { %v1108_v8 = vpop.permute.xlu0 %1107  ;;  %v1102_v58 = vpop.permute.xlu1 %1101 }
 0x260   : > { %v1113_v10 = vadd.f32 %v1108_v8, %v1105_v3  ;;  %v1106_v11 = vadd.f32 %v1102_v58, %v1098_v9 }
 0x262   : > { %v1115_v6 = vmul.f32 %v1113_v10, %v1113_v10 }
 0x263   : > { %v1110_v36 = vpop.permute.xlu1 %1109 }
 0x264   : > { %v1114_v13 = vadd.f32 %v1110_v36, %v1106_v11  ;;  %v1117_v14 = vadd.f32 %v1115_v6, %v934_v61 }
 0x266   : > { %v1116_v17 = vmul.f32 %v1114_v13, %v1114_v13  ;;  %v1119_v20 = vsel %vm560_vm0, %v1117_v14, 0.0 }
 0x268   : > { %v1118_v54 = vadd.f32 %v1116_v17, %v935_v26 }
 0x26a   : > { %v1120_v21 = vsel %vm560_vm0, %v1118_v54, 0.0 }
 0x26b   : > { %v1121_v63 = vadd.f32 %v1120_v21, %v1119_v20 }
 0x26d   : > { %1122 = vadd.xlane.f32.xlu0 %v1121_v63 }
 0x2fa   : > { %v1123_v1 = vpop.xlane.xlu0 %1122 }
 0x2fb   : > { %v1124_v23 = vrot.slane %v1123_v1, 4 }
 0x2fd   : > { %v1125_v30 = vadd.f32 %v1124_v23, %v1123_v1 }
 0x2ff   : > { %v1126_v40 = vrot.slane %v1125_v30, 2 }
 0x301   : > { %v1127_v41 = vadd.f32 %v1126_v40, %v1125_v30 }
 0x303   : > { %v1128_v42 = vrot.slane %v1127_v41, 1 }
 0x305   : > { %v1129_v43 = vadd.f32 %v1128_v42, %v1127_v41 }
 0x307   : > { %1260 = vpush %v1129_v43 }
 0x338   : > { %s1261_s4 = spop %1260 }
 0x339   : > { %v1131_v61 = vstv %s1261_s4 }
 0x33a   : > { %1132 = vst [vmem:[%s201_s22] sm:$0xff] %v1131_v61 }
 0x33b   : > { %1452 = shalt.err (!%p1449_p11)
}
 0x33c   : > { %s1453_s30 = scalar_lea.hbm %s2117_s16, 128  ;;  %s1457_s7 = scalar_lea.hbm %s2161_s2, 256 }
 0x33d   : > { %p1454_p3 = scmp.ne.s32.totalorder %s2117_s16, %s1453_s30  ;;  %p1458_p2 = scmp.lt.u32.totalorder %s2117_s16, %s2161_s2 }
 0x33e   : > { %p1459_p4 = scmp.lt.u32.totalorder %s1457_s7, %s1453_s30  ;;  %p1461_p13 = scmp.lt.u32.totalorder %s1453_s30, %s2117_s16 }
 0x33f   : > { %p1455_p8 = pnand %p1454_p3, %p2170_p1 }
 0x340   : > { %p1460_p6 = por %p1459_p4, %p1458_p2 }
 0x341   : > { %p1456_p0 = pneg %p1455_p8 }
 0x342   : > { %p1462_p12 = por %p1461_p13, %p1460_p6 }
 0x344   : > { %p1463_p10 = pnand %p1462_p12, %p1456_p0 }
 0x346   : > { %1466 = shalt.err (!%p1463_p10)
}
 0x347   : > { %1266 = dma.vmem_to_hbm [thread:$0]  (%p2170_p1), %s2112_s29, 128, %s2117_s16, %s1134_s27  }
 0x348 PF: > { %s1159_s17 = sand.u32 1, %s1497_s9   ;;  %p2171_p5 = scmp.ne.s32.totalorder %s2166_s21, 0 }
 0x349   : > { %p2172_p7 = scmp.ge.s32.totalorder %s1509_s12, 2  ;;  %s1160_s28 = scalar_lea.sflag [#allocation6], %s1159_s17 }
 0x34b   : > { %p1276_p9 = pnand %p2172_p7, %p2171_p5 }
 0x34d   : > { %1492 = dma.done.wait (!%p1276_p9), %s1160_s28, 128  }
 0x34e   : > { %1494 = vsyncadd (!%p1276_p9), %s1160_s28, 4294967168  ;;  %p18_p11 = scmp.ge.s32.totalorder %s1572_s15, 4   ;;  %s2173_s9 = smov %s1501_s10 }
 0x34f   : > { %s2174_s10 = smov %s1505_s11  ;;  %s2175_s11 = smov %s1584_s18 }
 0x350   : > { %s2176_s12 = smov %s1572_s15  ;;  %20 = sbr.rel (!%p18_p11) target bundleno = 7 (0x7), region = 86 }
 0x357   :  { %1165 = vsyncpa [#allocation5], 1 }
 0x358   :  { %1167 = vsyncpa [#allocation5 + $0x1], 1 }
 0x359   :  { %1168 = vsyncpa [#allocation8], 1 }
 0x35a   :  { %1170 = vsyncpa [#allocation8 + $0x1], 1 }
 0x35b   :  { %1171 = vsyncpa [#allocation6], 1 }
 0x35c   :  { %1173 = vsyncpa [#allocation6 + $0x1], 1 }

</bundles_post_ra>
